<compile_context>
chip_gen: v5e
topology: v5e:2x2
jax: 0.10.0
libtpu: 0.0.40
codegen_flags: <defaults>
</compile_context>

<pallas_src>
import functools

import numpy as np
import jax
import jax.numpy as jnp
from jax.experimental import pallas as pl
from jax.experimental.pallas import tpu as pltpu


def _round_up(a, b):
    return (a + b - 1) // b * b


# ---------------------------------------------------------------------------
# Pallas kernel: one grid step processes TILE_N samples entirely in VMEM
# ---------------------------------------------------------------------------
def _sigmoid(y):
    # single EUP op (tanh) instead of exp + reciprocal
    return 0.5 * jnp.tanh(0.5 * y) + 0.5


def _lenet5_kernel(x_ref, w1_ref, b1_ref, w2_ref, b2_ref,
                   fc1_ref, bf1_ref, fc2_ref, bf2_ref, fc3_ref, bf3_ref,
                   o_ref, *, tile_n):
    # x_ref  : (4, 8*tile_n, 32)  x_ref[m, i*tile_n + n, w] = x[n, 4*i + m, w]
    # w1_ref : (6, 32, 84)   banded conv1(+pool) weights, out lane = j*6 + c
    # w2_ref : (6, 84, 80)   banded conv2(+pool) weights, out lane = s*16 + c2
    # fc1_ref: (5, 80, 120)  fc1 weights regrouped per pooled row r
    # o_ref  : (tile_n, 10)  logits for this batch tile
    bf16, f32 = jnp.bfloat16, jnp.float32

    # ---- stage 1: sigmoid(avg_pool(conv1(x))) -----------------------------
    # h1[eh][i*tile_n + n, j*6 + c] = H1[n, c, 2*i + eh, j],  i in [0,7), j in [0,14)
    h1 = []
    for eh in range(2):
        acc = jnp.zeros((7 * tile_n, 84), f32)
        for u in range(6):
            c = 2 * eh + u                          # absolute input-row offset
            m, i0 = c % 4, c // 4
            xs = x_ref[m, i0 * tile_n:(i0 + 7) * tile_n, :].astype(bf16)
            acc = acc + jnp.dot(xs, w1_ref[u], preferred_element_type=f32)
        h1.append(_sigmoid(acc + b1_ref[...]).astype(bf16))

    # ---- stage 2: sigmoid(avg_pool(conv2(h1))) ----------------------------
    # h2[r*tile_n + n, s*16 + c2] = H2[n, c2, r, s],  r, s in [0,5)
    acc = jnp.zeros((5 * tile_n, 80), f32)
    for uu in range(6):
        eh, a = uu % 2, uu // 2
        acc = acc + jnp.dot(h1[eh][a * tile_n:(a + 5) * tile_n, :],
                            w2_ref[uu], preferred_element_type=f32)
    h2 = _sigmoid(acc + b2_ref[...]).astype(bf16)

    # ---- MLP head (M = tile_n for every GEMM) ------------------------------
    z = jnp.zeros((tile_n, 120), f32)
    for r in range(5):                               # fc1 over NCHW flatten
        z = z + jnp.dot(h2[r * tile_n:(r + 1) * tile_n, :], fc1_ref[r],
                        preferred_element_type=f32)
    z = _sigmoid(z + bf1_ref[...]).astype(bf16)
    z = _sigmoid(jnp.dot(z, fc2_ref[...], preferred_element_type=f32)
                 + bf2_ref[...]).astype(bf16)
    logits = jnp.dot(z, fc3_ref[...], preferred_element_type=f32) + bf3_ref[...]
    o_ref[...] = logits                              # one dense store per tile


# ---------------------------------------------------------------------------
# One-time parameter preparation (host, outside the per-forward path)
# ---------------------------------------------------------------------------
def _pool_conv_weight(w_oihw):
    """Fold conv(5x5, stride 1) + avg_pool(2,2) into one 6x6 stride-2 kernel
    (including the 1/4 pool scale): returns (6, 6, cin, cout)."""
    w = np.asarray(w_oihw, np.float32).transpose(2, 3, 1, 0)   # (kh, kw, ci, co)
    kh, kw = w.shape[0], w.shape[1]
    we = np.zeros((kh + 1, kw + 1) + w.shape[2:], np.float32)
    for qh in range(2):
        for qw in range(2):
            we[qh:qh + kh, qw:qw + kw] += w
    return we * 0.25


def prepare_params(params):
    """Restructure PyTorch-layout parameters into the banded, bf16 operands
    the fused kernel consumes (done once, not per forward)."""
    w1e = _pool_conv_weight(params["conv1_w"])       # (6, 6, 1, 6)
    w2e = _pool_conv_weight(params["conv2_w"])       # (6, 6, 6, 16)

    # conv1: banded over the 32 input cols -> 14 output cols x 6 ch = 84 lanes
    w1 = np.zeros((6, 32, 84), np.float32)
    for u in range(6):
        for j in range(14):
            for v in range(6):
                w1[u, 2 * j + v, j * 6:(j + 1) * 6] += w1e[u, v, 0, :]

    # conv2: banded over 84 h1 lanes (j*6+c1) -> 5 output cols x 16 ch = 80 lanes
    w2 = np.zeros((6, 84, 80), np.float32)
    for uu in range(6):
        for s in range(5):
            for vv in range(6):
                j = 2 * s + vv
                w2[uu, j * 6:(j + 1) * 6, s * 16:(s + 1) * 16] += w2e[uu, vv, :, :]

    # fc1: absorb PyTorch's NCHW view(-1, 400) (index c2*25 + r*5 + s) into a
    # per-r regrouping of the rows -> (5, 80, 120), row index = s*16 + c2.
    fc1wr = (np.asarray(params["fc1_w"], np.float32)
             .reshape(16, 5, 5, 120).transpose(1, 2, 0, 3).reshape(5, 80, 120))

    bf16 = jnp.bfloat16
    f32 = jnp.float32
    return {
        "w1": jnp.asarray(w1, bf16),
        "b1": jnp.asarray(np.tile(np.asarray(params["conv1_b"], np.float32), 14)
                          .reshape(1, 84), f32),
        "w2": jnp.asarray(w2, bf16),
        "b2": jnp.asarray(np.tile(np.asarray(params["conv2_b"], np.float32), 5)
                          .reshape(1, 80), f32),
        "fc1": jnp.asarray(fc1wr, bf16),
        "bf1": jnp.asarray(params["fc1_b"], f32).reshape(1, 120),
        "fc2": jnp.asarray(params["fc2_w"], bf16),
        "bf2": jnp.asarray(params["fc2_b"], f32).reshape(1, 84),
        "fc3": jnp.asarray(params["fc3_w"], bf16),
        "bf3": jnp.asarray(params["fc3_b"], f32).reshape(1, 10),
    }


# ---------------------------------------------------------------------------
# Forward wrapper: layout plumbing + one gridded pallas_call
# ---------------------------------------------------------------------------
def lenet5_forward(x_nchw, prep, tile_n=128):
    n = x_nchw.shape[0]
    tile_n = min(tile_n, _round_up(max(n, 1), 8))
    n_pad = _round_up(n, tile_n)
    nt = n_pad // tile_n

    x = x_nchw.reshape(n, 32, 32).astype(jnp.float32)
    if n_pad != n:
        x = jnp.pad(x, ((0, n_pad - n), (0, 0), (0, 0)))
    # xr[b*4 + m, i*tile_n + nl, w] = x[b*tile_n + nl, 4*i + m, w]
    xr = (x.reshape(nt, tile_n, 8, 4, 32)
            .transpose(0, 3, 2, 1, 4)
            .reshape(nt * 4, 8 * tile_n, 32))

    weights = (prep["w1"], prep["b1"], prep["w2"], prep["b2"],
               prep["fc1"], prep["bf1"], prep["fc2"], prep["bf2"],
               prep["fc3"], prep["bf3"])

    def _resident(arr):       # whole small weight resident in VMEM, never re-fetched
        nd = arr.ndim
        return pl.BlockSpec(arr.shape, lambda b, _nd=nd: (0,) * _nd)

    kernel = functools.partial(_lenet5_kernel, tile_n=tile_n)
    out = pl.pallas_call(
        kernel,
        out_shape=jax.ShapeDtypeStruct((n_pad, 10), jnp.float32),
        grid=(nt,),
        in_specs=[pl.BlockSpec((4, 8 * tile_n, 32), lambda b: (b, 0, 0))]
                 + [_resident(w) for w in weights],
        out_specs=pl.BlockSpec((tile_n, 10), lambda b: (b, 0)),
        compiler_params=pltpu.CompilerParams(
            dimension_semantics=("parallel",)),
    )(xr, *weights)
    return out[:n]


# ---------------------------------------------------------------------------
# Pure-JAX reference (mirrors the PyTorch forward) for a sanity check
# ---------------------------------------------------------------------------
def lenet5_reference(x_nchw, params):
    def conv(x, w, b):
        y = jax.lax.conv_general_dilated(
            x, w, window_strides=(1, 1), padding="VALID",
            dimension_numbers=("NCHW", "OIHW", "NCHW"))
        return y + b.reshape(1, -1, 1, 1)

    def avg_pool(x):
        n, c, h, w = x.shape
        return x.reshape(n, c, h // 2, 2, w // 2, 2).mean(axis=(3, 5))

    h = jax.nn.sigmoid(avg_pool(conv(x_nchw, params["conv1_w"], params["conv1_b"])))
    h = jax.nn.sigmoid(avg_pool(conv(h, params["conv2_w"], params["conv2_b"])))
    h = h.reshape(h.shape[0], -1)                    # NCHW flatten -> (N, 400)
    h = jax.nn.sigmoid(h @ params["fc1_w"] + params["fc1_b"])
    h = jax.nn.sigmoid(h @ params["fc2_w"] + params["fc2_b"])
    return h @ params["fc3_w"] + params["fc3_b"]


# ---------------------------------------------------------------------------
# Deterministic parameter init (shapes from LeNet5.__init__)
# ---------------------------------------------------------------------------
def init_params(key):
    ks = jax.random.split(key, 10)
    rnd = lambda k, s, sc: jax.random.normal(k, s, jnp.float32) * sc
    return {
        "conv1_w": rnd(ks[0], (6, 1, 5, 5), 0.2),    # MyConv(1, 6, 5, 1)
        "conv1_b": rnd(ks[1], (6,), 0.1),
        "conv2_w": rnd(ks[2], (16, 6, 5, 5), 0.1),   # MyConv(6, 16, 5, 1)
        "conv2_b": rnd(ks[3], (16,), 0.1),
        "fc1_w": rnd(ks[4], (400, 120), 0.05),       # MyLinear(400, 120)
        "fc1_b": rnd(ks[5], (120,), 0.05),
        "fc2_w": rnd(ks[6], (120, 84), 0.05),        # MyLinear(120, 84)
        "fc2_b": rnd(ks[7], (84,), 0.05),
        "fc3_w": rnd(ks[8], (84, 10), 0.05),         # MyLinear(84, 10)
        "fc3_b": rnd(ks[9], (10,), 0.05),
    }


if __name__ == "__main__":
    key = jax.random.PRNGKey(0)
    pkey, xkey = jax.random.split(key)
    params = init_params(pkey)
    prep = prepare_params(params)                    # one-time weight prep
    x = jax.random.normal(xkey, (2, 1, 32, 32), jnp.float32)  # NCHW, batch=2

    fwd = jax.jit(lenet5_forward)
    out = jax.block_until_ready(fwd(x, prep))
    assert out.shape == (2, 10) and out.dtype == jnp.float32

    ref = jax.block_until_ready(lenet5_reference(x, params))
    err = float(jnp.max(jnp.abs(out - ref)))
    assert err < 3e-2, f"kernel/reference mismatch: max abs err = {err}"
    print("KERNEL_OK")
</pallas_src>

<mosaic_0001>
module attributes {stable_mosaic.version = 11 : i64} {
  func.func @_lenet5_kernel(%arg0: i32, %arg1: memref<4x64x32xf32, #tpu.memory_space<vmem>>, %arg2: memref<6x32x84xbf16, #tpu.memory_space<vmem>>, %arg3: memref<1x84xf32, #tpu.memory_space<vmem>>, %arg4: memref<6x84x80xbf16, #tpu.memory_space<vmem>>, %arg5: memref<1x80xf32, #tpu.memory_space<vmem>>, %arg6: memref<5x80x120xbf16, #tpu.memory_space<vmem>>, %arg7: memref<1x120xf32, #tpu.memory_space<vmem>>, %arg8: memref<120x84xbf16, #tpu.memory_space<vmem>>, %arg9: memref<1x84xf32, #tpu.memory_space<vmem>>, %arg10: memref<84x10xbf16, #tpu.memory_space<vmem>>, %arg11: memref<1x10xf32, #tpu.memory_space<vmem>>, %arg12: memref<8x10xf32, #tpu.memory_space<vmem>>) attributes {dimension_semantics = [#tpu.dimension_semantics<parallel>], iteration_bounds = array<i64: 1>, scalar_prefetch = 0 : i64, scratch_operands = 0 : i64, tpu.core_type = #tpu.core_type<tc>, window_params = [{transform_indices = @transform_0, window_bounds = array<i64: 4, 64, 32>}, {pipeline_mode = #tpu.pipeline_mode<synchronous>, transform_indices = @transform_1, window_bounds = array<i64: 6, 32, 84>}, {pipeline_mode = #tpu.pipeline_mode<synchronous>, transform_indices = @transform_2, window_bounds = array<i64: 1, 84>}, {pipeline_mode = #tpu.pipeline_mode<synchronous>, transform_indices = @transform_3, window_bounds = array<i64: 6, 84, 80>}, {pipeline_mode = #tpu.pipeline_mode<synchronous>, transform_indices = @transform_4, window_bounds = array<i64: 1, 80>}, {pipeline_mode = #tpu.pipeline_mode<synchronous>, transform_indices = @transform_5, window_bounds = array<i64: 5, 80, 120>}, {pipeline_mode = #tpu.pipeline_mode<synchronous>, transform_indices = @transform_6, window_bounds = array<i64: 1, 120>}, {pipeline_mode = #tpu.pipeline_mode<synchronous>, transform_indices = @transform_7, window_bounds = array<i64: 120, 84>}, {pipeline_mode = #tpu.pipeline_mode<synchronous>, transform_indices = @transform_8, window_bounds = array<i64: 1, 84>}, {pipeline_mode = #tpu.pipeline_mode<synchronous>, transform_indices = @transform_9, window_bounds = array<i64: 84, 10>}, {pipeline_mode = #tpu.pipeline_mode<synchronous>, transform_indices = @transform_10, window_bounds = array<i64: 1, 10>}, {transform_indices = @transform_11, window_bounds = array<i64: 8, 10>}]} {
    %cst = arith.constant 0.000000e+00 : f32
    %0 = vector.broadcast %cst : f32 to vector<56x84xf32>
    %c0 = arith.constant 0 : index
    %c0_0 = arith.constant 0 : index
    %c0_1 = arith.constant 0 : index
    %1 = vector.load %arg1[%c0, %c0_0, %c0_1] : memref<4x64x32xf32, #tpu.memory_space<vmem>>, vector<1x56x32xf32>
    %2 = vector.shape_cast %1 : vector<1x56x32xf32> to vector<56x32xf32>
    %3 = arith.truncf %2 : vector<56x32xf32> to vector<56x32xbf16>
    %c0_2 = arith.constant 0 : index
    %c0_3 = arith.constant 0 : index
    %c0_4 = arith.constant 0 : index
    %4 = vector.load %arg2[%c0_2, %c0_3, %c0_4] : memref<6x32x84xbf16, #tpu.memory_space<vmem>>, vector<1x32x84xbf16>
    %5 = vector.shape_cast %4 : vector<1x32x84xbf16> to vector<32x84xbf16>
    %cst_5 = arith.constant dense<0.000000e+00> : vector<56x84xf32>
    %6 = tpu.matmul %3, %5, %cst_5 {dimension_numbers = #tpu.dot_dimension_numbers<[1], [0], [0], [1], [0, 0, 1, 1], [], []>} : vector<56x32xbf16>, vector<32x84xbf16>, vector<56x84xf32> -> vector<56x84xf32>
    %7 = arith.addf %0, %6 : vector<56x84xf32>
    %c1 = arith.constant 1 : index
    %c0_6 = arith.constant 0 : index
    %c0_7 = arith.constant 0 : index
    %8 = vector.load %arg1[%c1, %c0_6, %c0_7] : memref<4x64x32xf32, #tpu.memory_space<vmem>>, vector<1x56x32xf32>
    %9 = vector.shape_cast %8 : vector<1x56x32xf32> to vector<56x32xf32>
    %10 = arith.truncf %9 : vector<56x32xf32> to vector<56x32xbf16>
    %c1_8 = arith.constant 1 : index
    %c0_9 = arith.constant 0 : index
    %c0_10 = arith.constant 0 : index
    %11 = vector.load %arg2[%c1_8, %c0_9, %c0_10] : memref<6x32x84xbf16, #tpu.memory_space<vmem>>, vector<1x32x84xbf16>
    %12 = vector.shape_cast %11 : vector<1x32x84xbf16> to vector<32x84xbf16>
    %cst_11 = arith.constant dense<0.000000e+00> : vector<56x84xf32>
    %13 = tpu.matmul %10, %12, %cst_11 {dimension_numbers = #tpu.dot_dimension_numbers<[1], [0], [0], [1], [0, 0, 1, 1], [], []>} : vector<56x32xbf16>, vector<32x84xbf16>, vector<56x84xf32> -> vector<56x84xf32>
    %14 = arith.addf %7, %13 : vector<56x84xf32>
    %c2 = arith.constant 2 : index
    %c0_12 = arith.constant 0 : index
    %c0_13 = arith.constant 0 : index
    %15 = vector.load %arg1[%c2, %c0_12, %c0_13] : memref<4x64x32xf32, #tpu.memory_space<vmem>>, vector<1x56x32xf32>
    %16 = vector.shape_cast %15 : vector<1x56x32xf32> to vector<56x32xf32>
    %17 = arith.truncf %16 : vector<56x32xf32> to vector<56x32xbf16>
    %c2_14 = arith.constant 2 : index
    %c0_15 = arith.constant 0 : index
    %c0_16 = arith.constant 0 : index
    %18 = vector.load %arg2[%c2_14, %c0_15, %c0_16] : memref<6x32x84xbf16, #tpu.memory_space<vmem>>, vector<1x32x84xbf16>
    %19 = vector.shape_cast %18 : vector<1x32x84xbf16> to vector<32x84xbf16>
    %cst_17 = arith.constant dense<0.000000e+00> : vector<56x84xf32>
    %20 = tpu.matmul %17, %19, %cst_17 {dimension_numbers = #tpu.dot_dimension_numbers<[1], [0], [0], [1], [0, 0, 1, 1], [], []>} : vector<56x32xbf16>, vector<32x84xbf16>, vector<56x84xf32> -> vector<56x84xf32>
    %21 = arith.addf %14, %20 : vector<56x84xf32>
    %c3 = arith.constant 3 : index
    %c0_18 = arith.constant 0 : index
    %c0_19 = arith.constant 0 : index
    %22 = vector.load %arg1[%c3, %c0_18, %c0_19] : memref<4x64x32xf32, #tpu.memory_space<vmem>>, vector<1x56x32xf32>
    %23 = vector.shape_cast %22 : vector<1x56x32xf32> to vector<56x32xf32>
    %24 = arith.truncf %23 : vector<56x32xf32> to vector<56x32xbf16>
    %c3_20 = arith.constant 3 : index
    %c0_21 = arith.constant 0 : index
    %c0_22 = arith.constant 0 : index
    %25 = vector.load %arg2[%c3_20, %c0_21, %c0_22] : memref<6x32x84xbf16, #tpu.memory_space<vmem>>, vector<1x32x84xbf16>
    %26 = vector.shape_cast %25 : vector<1x32x84xbf16> to vector<32x84xbf16>
    %cst_23 = arith.constant dense<0.000000e+00> : vector<56x84xf32>
    %27 = tpu.matmul %24, %26, %cst_23 {dimension_numbers = #tpu.dot_dimension_numbers<[1], [0], [0], [1], [0, 0, 1, 1], [], []>} : vector<56x32xbf16>, vector<32x84xbf16>, vector<56x84xf32> -> vector<56x84xf32>
    %28 = arith.addf %21, %27 : vector<56x84xf32>
    %c0_24 = arith.constant 0 : index
    %c8 = arith.constant 8 : index
    %c0_25 = arith.constant 0 : index
    %29 = vector.load %arg1[%c0_24, %c8, %c0_25] : memref<4x64x32xf32, #tpu.memory_space<vmem>>, vector<1x56x32xf32>
    %30 = vector.shape_cast %29 : vector<1x56x32xf32> to vector<56x32xf32>
    %31 = arith.truncf %30 : vector<56x32xf32> to vector<56x32xbf16>
    %c4 = arith.constant 4 : index
    %c0_26 = arith.constant 0 : index
    %c0_27 = arith.constant 0 : index
    %32 = vector.load %arg2[%c4, %c0_26, %c0_27] : memref<6x32x84xbf16, #tpu.memory_space<vmem>>, vector<1x32x84xbf16>
    %33 = vector.shape_cast %32 : vector<1x32x84xbf16> to vector<32x84xbf16>
    %cst_28 = arith.constant dense<0.000000e+00> : vector<56x84xf32>
    %34 = tpu.matmul %31, %33, %cst_28 {dimension_numbers = #tpu.dot_dimension_numbers<[1], [0], [0], [1], [0, 0, 1, 1], [], []>} : vector<56x32xbf16>, vector<32x84xbf16>, vector<56x84xf32> -> vector<56x84xf32>
    %35 = arith.addf %28, %34 : vector<56x84xf32>
    %c1_29 = arith.constant 1 : index
    %c8_30 = arith.constant 8 : index
    %c0_31 = arith.constant 0 : index
    %36 = vector.load %arg1[%c1_29, %c8_30, %c0_31] : memref<4x64x32xf32, #tpu.memory_space<vmem>>, vector<1x56x32xf32>
    %37 = vector.shape_cast %36 : vector<1x56x32xf32> to vector<56x32xf32>
    %38 = arith.truncf %37 : vector<56x32xf32> to vector<56x32xbf16>
    %c5 = arith.constant 5 : index
    %c0_32 = arith.constant 0 : index
    %c0_33 = arith.constant 0 : index
    %39 = vector.load %arg2[%c5, %c0_32, %c0_33] : memref<6x32x84xbf16, #tpu.memory_space<vmem>>, vector<1x32x84xbf16>
    %40 = vector.shape_cast %39 : vector<1x32x84xbf16> to vector<32x84xbf16>
    %cst_34 = arith.constant dense<0.000000e+00> : vector<56x84xf32>
    %41 = tpu.matmul %38, %40, %cst_34 {dimension_numbers = #tpu.dot_dimension_numbers<[1], [0], [0], [1], [0, 0, 1, 1], [], []>} : vector<56x32xbf16>, vector<32x84xbf16>, vector<56x84xf32> -> vector<56x84xf32>
    %42 = arith.addf %35, %41 : vector<56x84xf32>
    %c0_35 = arith.constant 0 : index
    %c0_36 = arith.constant 0 : index
    %43 = vector.load %arg3[%c0_35, %c0_36] : memref<1x84xf32, #tpu.memory_space<vmem>>, vector<1x84xf32>
    %44 = vector.broadcast %43 : vector<1x84xf32> to vector<56x84xf32>
    %45 = arith.addf %42, %44 : vector<56x84xf32>
    %cst_37 = arith.constant 5.000000e-01 : f32
    %46 = vector.broadcast %cst_37 : f32 to vector<56x84xf32>
    %47 = arith.mulf %46, %45 : vector<56x84xf32>
    %48 = math.tanh %47 : vector<56x84xf32>
    %cst_38 = arith.constant 5.000000e-01 : f32
    %49 = vector.broadcast %cst_38 : f32 to vector<56x84xf32>
    %50 = arith.mulf %49, %48 : vector<56x84xf32>
    %cst_39 = arith.constant 5.000000e-01 : f32
    %51 = vector.broadcast %cst_39 : f32 to vector<56x84xf32>
    %52 = arith.addf %50, %51 : vector<56x84xf32>
    %53 = arith.truncf %52 : vector<56x84xf32> to vector<56x84xbf16>
    %cst_40 = arith.constant 0.000000e+00 : f32
    %54 = vector.broadcast %cst_40 : f32 to vector<56x84xf32>
    %c2_41 = arith.constant 2 : index
    %c0_42 = arith.constant 0 : index
    %c0_43 = arith.constant 0 : index
    %55 = vector.load %arg1[%c2_41, %c0_42, %c0_43] : memref<4x64x32xf32, #tpu.memory_space<vmem>>, vector<1x56x32xf32>
    %56 = vector.shape_cast %55 : vector<1x56x32xf32> to vector<56x32xf32>
    %57 = arith.truncf %56 : vector<56x32xf32> to vector<56x32xbf16>
    %c0_44 = arith.constant 0 : index
    %c0_45 = arith.constant 0 : index
    %c0_46 = arith.constant 0 : index
    %58 = vector.load %arg2[%c0_44, %c0_45, %c0_46] : memref<6x32x84xbf16, #tpu.memory_space<vmem>>, vector<1x32x84xbf16>
    %59 = vector.shape_cast %58 : vector<1x32x84xbf16> to vector<32x84xbf16>
    %cst_47 = arith.constant dense<0.000000e+00> : vector<56x84xf32>
    %60 = tpu.matmul %57, %59, %cst_47 {dimension_numbers = #tpu.dot_dimension_numbers<[1], [0], [0], [1], [0, 0, 1, 1], [], []>} : vector<56x32xbf16>, vector<32x84xbf16>, vector<56x84xf32> -> vector<56x84xf32>
    %61 = arith.addf %54, %60 : vector<56x84xf32>
    %c3_48 = arith.constant 3 : index
    %c0_49 = arith.constant 0 : index
    %c0_50 = arith.constant 0 : index
    %62 = vector.load %arg1[%c3_48, %c0_49, %c0_50] : memref<4x64x32xf32, #tpu.memory_space<vmem>>, vector<1x56x32xf32>
    %63 = vector.shape_cast %62 : vector<1x56x32xf32> to vector<56x32xf32>
    %64 = arith.truncf %63 : vector<56x32xf32> to vector<56x32xbf16>
    %c1_51 = arith.constant 1 : index
    %c0_52 = arith.constant 0 : index
    %c0_53 = arith.constant 0 : index
    %65 = vector.load %arg2[%c1_51, %c0_52, %c0_53] : memref<6x32x84xbf16, #tpu.memory_space<vmem>>, vector<1x32x84xbf16>
    %66 = vector.shape_cast %65 : vector<1x32x84xbf16> to vector<32x84xbf16>
    %cst_54 = arith.constant dense<0.000000e+00> : vector<56x84xf32>
    %67 = tpu.matmul %64, %66, %cst_54 {dimension_numbers = #tpu.dot_dimension_numbers<[1], [0], [0], [1], [0, 0, 1, 1], [], []>} : vector<56x32xbf16>, vector<32x84xbf16>, vector<56x84xf32> -> vector<56x84xf32>
    %68 = arith.addf %61, %67 : vector<56x84xf32>
    %c0_55 = arith.constant 0 : index
    %c8_56 = arith.constant 8 : index
    %c0_57 = arith.constant 0 : index
    %69 = vector.load %arg1[%c0_55, %c8_56, %c0_57] : memref<4x64x32xf32, #tpu.memory_space<vmem>>, vector<1x56x32xf32>
    %70 = vector.shape_cast %69 : vector<1x56x32xf32> to vector<56x32xf32>
    %71 = arith.truncf %70 : vector<56x32xf32> to vector<56x32xbf16>
    %c2_58 = arith.constant 2 : index
    %c0_59 = arith.constant 0 : index
    %c0_60 = arith.constant 0 : index
    %72 = vector.load %arg2[%c2_58, %c0_59, %c0_60] : memref<6x32x84xbf16, #tpu.memory_space<vmem>>, vector<1x32x84xbf16>
    %73 = vector.shape_cast %72 : vector<1x32x84xbf16> to vector<32x84xbf16>
    %cst_61 = arith.constant dense<0.000000e+00> : vector<56x84xf32>
    %74 = tpu.matmul %71, %73, %cst_61 {dimension_numbers = #tpu.dot_dimension_numbers<[1], [0], [0], [1], [0, 0, 1, 1], [], []>} : vector<56x32xbf16>, vector<32x84xbf16>, vector<56x84xf32> -> vector<56x84xf32>
    %75 = arith.addf %68, %74 : vector<56x84xf32>
    %c1_62 = arith.constant 1 : index
    %c8_63 = arith.constant 8 : index
    %c0_64 = arith.constant 0 : index
    %76 = vector.load %arg1[%c1_62, %c8_63, %c0_64] : memref<4x64x32xf32, #tpu.memory_space<vmem>>, vector<1x56x32xf32>
    %77 = vector.shape_cast %76 : vector<1x56x32xf32> to vector<56x32xf32>
    %78 = arith.truncf %77 : vector<56x32xf32> to vector<56x32xbf16>
    %c3_65 = arith.constant 3 : index
    %c0_66 = arith.constant 0 : index
    %c0_67 = arith.constant 0 : index
    %79 = vector.load %arg2[%c3_65, %c0_66, %c0_67] : memref<6x32x84xbf16, #tpu.memory_space<vmem>>, vector<1x32x84xbf16>
    %80 = vector.shape_cast %79 : vector<1x32x84xbf16> to vector<32x84xbf16>
    %cst_68 = arith.constant dense<0.000000e+00> : vector<56x84xf32>
    %81 = tpu.matmul %78, %80, %cst_68 {dimension_numbers = #tpu.dot_dimension_numbers<[1], [0], [0], [1], [0, 0, 1, 1], [], []>} : vector<56x32xbf16>, vector<32x84xbf16>, vector<56x84xf32> -> vector<56x84xf32>
    %82 = arith.addf %75, %81 : vector<56x84xf32>
    %c2_69 = arith.constant 2 : index
    %c8_70 = arith.constant 8 : index
    %c0_71 = arith.constant 0 : index
    %83 = vector.load %arg1[%c2_69, %c8_70, %c0_71] : memref<4x64x32xf32, #tpu.memory_space<vmem>>, vector<1x56x32xf32>
    %84 = vector.shape_cast %83 : vector<1x56x32xf32> to vector<56x32xf32>
    %85 = arith.truncf %84 : vector<56x32xf32> to vector<56x32xbf16>
    %c4_72 = arith.constant 4 : index
    %c0_73 = arith.constant 0 : index
    %c0_74 = arith.constant 0 : index
    %86 = vector.load %arg2[%c4_72, %c0_73, %c0_74] : memref<6x32x84xbf16, #tpu.memory_space<vmem>>, vector<1x32x84xbf16>
    %87 = vector.shape_cast %86 : vector<1x32x84xbf16> to vector<32x84xbf16>
    %cst_75 = arith.constant dense<0.000000e+00> : vector<56x84xf32>
    %88 = tpu.matmul %85, %87, %cst_75 {dimension_numbers = #tpu.dot_dimension_numbers<[1], [0], [0], [1], [0, 0, 1, 1], [], []>} : vector<56x32xbf16>, vector<32x84xbf16>, vector<56x84xf32> -> vector<56x84xf32>
    %89 = arith.addf %82, %88 : vector<56x84xf32>
    %c3_76 = arith.constant 3 : index
    %c8_77 = arith.constant 8 : index
    %c0_78 = arith.constant 0 : index
    %90 = vector.load %arg1[%c3_76, %c8_77, %c0_78] : memref<4x64x32xf32, #tpu.memory_space<vmem>>, vector<1x56x32xf32>
    %91 = vector.shape_cast %90 : vector<1x56x32xf32> to vector<56x32xf32>
    %92 = arith.truncf %91 : vector<56x32xf32> to vector<56x32xbf16>
    %c5_79 = arith.constant 5 : index
    %c0_80 = arith.constant 0 : index
    %c0_81 = arith.constant 0 : index
    %93 = vector.load %arg2[%c5_79, %c0_80, %c0_81] : memref<6x32x84xbf16, #tpu.memory_space<vmem>>, vector<1x32x84xbf16>
    %94 = vector.shape_cast %93 : vector<1x32x84xbf16> to vector<32x84xbf16>
    %cst_82 = arith.constant dense<0.000000e+00> : vector<56x84xf32>
    %95 = tpu.matmul %92, %94, %cst_82 {dimension_numbers = #tpu.dot_dimension_numbers<[1], [0], [0], [1], [0, 0, 1, 1], [], []>} : vector<56x32xbf16>, vector<32x84xbf16>, vector<56x84xf32> -> vector<56x84xf32>
    %96 = arith.addf %89, %95 : vector<56x84xf32>
    %c0_83 = arith.constant 0 : index
    %c0_84 = arith.constant 0 : index
    %97 = vector.load %arg3[%c0_83, %c0_84] : memref<1x84xf32, #tpu.memory_space<vmem>>, vector<1x84xf32>
    %98 = vector.broadcast %97 : vector<1x84xf32> to vector<56x84xf32>
    %99 = arith.addf %96, %98 : vector<56x84xf32>
    %cst_85 = arith.constant 5.000000e-01 : f32
    %100 = vector.broadcast %cst_85 : f32 to vector<56x84xf32>
    %101 = arith.mulf %100, %99 : vector<56x84xf32>
    %102 = math.tanh %101 : vector<56x84xf32>
    %cst_86 = arith.constant 5.000000e-01 : f32
    %103 = vector.broadcast %cst_86 : f32 to vector<56x84xf32>
    %104 = arith.mulf %103, %102 : vector<56x84xf32>
    %cst_87 = arith.constant 5.000000e-01 : f32
    %105 = vector.broadcast %cst_87 : f32 to vector<56x84xf32>
    %106 = arith.addf %104, %105 : vector<56x84xf32>
    %107 = arith.truncf %106 : vector<56x84xf32> to vector<56x84xbf16>
    %cst_88 = arith.constant 0.000000e+00 : f32
    %108 = vector.broadcast %cst_88 : f32 to vector<40x80xf32>
    %109 = vector.extract_strided_slice %53 {offsets = [0, 0], sizes = [40, 84], strides = [1, 1]} : vector<56x84xbf16> to vector<40x84xbf16>
    %c0_89 = arith.constant 0 : index
    %c0_90 = arith.constant 0 : index
    %c0_91 = arith.constant 0 : index
    %110 = vector.load %arg4[%c0_89, %c0_90, %c0_91] : memref<6x84x80xbf16, #tpu.memory_space<vmem>>, vector<1x84x80xbf16>
    %111 = vector.shape_cast %110 : vector<1x84x80xbf16> to vector<84x80xbf16>
    %cst_92 = arith.constant dense<0.000000e+00> : vector<40x80xf32>
    %112 = tpu.matmul %109, %111, %cst_92 {dimension_numbers = #tpu.dot_dimension_numbers<[1], [0], [0], [1], [0, 0, 1, 1], [], []>} : vector<40x84xbf16>, vector<84x80xbf16>, vector<40x80xf32> -> vector<40x80xf32>
    %113 = arith.addf %108, %112 : vector<40x80xf32>
    %114 = vector.extract_strided_slice %107 {offsets = [0, 0], sizes = [40, 84], strides = [1, 1]} : vector<56x84xbf16> to vector<40x84xbf16>
    %c1_93 = arith.constant 1 : index
    %c0_94 = arith.constant 0 : index
    %c0_95 = arith.constant 0 : index
    %115 = vector.load %arg4[%c1_93, %c0_94, %c0_95] : memref<6x84x80xbf16, #tpu.memory_space<vmem>>, vector<1x84x80xbf16>
    %116 = vector.shape_cast %115 : vector<1x84x80xbf16> to vector<84x80xbf16>
    %cst_96 = arith.constant dense<0.000000e+00> : vector<40x80xf32>
    %117 = tpu.matmul %114, %116, %cst_96 {dimension_numbers = #tpu.dot_dimension_numbers<[1], [0], [0], [1], [0, 0, 1, 1], [], []>} : vector<40x84xbf16>, vector<84x80xbf16>, vector<40x80xf32> -> vector<40x80xf32>
    %118 = arith.addf %113, %117 : vector<40x80xf32>
    %119 = vector.extract_strided_slice %53 {offsets = [8, 0], sizes = [40, 84], strides = [1, 1]} : vector<56x84xbf16> to vector<40x84xbf16>
    %c2_97 = arith.constant 2 : index
    %c0_98 = arith.constant 0 : index
    %c0_99 = arith.constant 0 : index
    %120 = vector.load %arg4[%c2_97, %c0_98, %c0_99] : memref<6x84x80xbf16, #tpu.memory_space<vmem>>, vector<1x84x80xbf16>
    %121 = vector.shape_cast %120 : vector<1x84x80xbf16> to vector<84x80xbf16>
    %cst_100 = arith.constant dense<0.000000e+00> : vector<40x80xf32>
    %122 = tpu.matmul %119, %121, %cst_100 {dimension_numbers = #tpu.dot_dimension_numbers<[1], [0], [0], [1], [0, 0, 1, 1], [], []>} : vector<40x84xbf16>, vector<84x80xbf16>, vector<40x80xf32> -> vector<40x80xf32>
    %123 = arith.addf %118, %122 : vector<40x80xf32>
    %124 = vector.extract_strided_slice %107 {offsets = [8, 0], sizes = [40, 84], strides = [1, 1]} : vector<56x84xbf16> to vector<40x84xbf16>
    %c3_101 = arith.constant 3 : index
    %c0_102 = arith.constant 0 : index
    %c0_103 = arith.constant 0 : index
    %125 = vector.load %arg4[%c3_101, %c0_102, %c0_103] : memref<6x84x80xbf16, #tpu.memory_space<vmem>>, vector<1x84x80xbf16>
    %126 = vector.shape_cast %125 : vector<1x84x80xbf16> to vector<84x80xbf16>
    %cst_104 = arith.constant dense<0.000000e+00> : vector<40x80xf32>
    %127 = tpu.matmul %124, %126, %cst_104 {dimension_numbers = #tpu.dot_dimension_numbers<[1], [0], [0], [1], [0, 0, 1, 1], [], []>} : vector<40x84xbf16>, vector<84x80xbf16>, vector<40x80xf32> -> vector<40x80xf32>
    %128 = arith.addf %123, %127 : vector<40x80xf32>
    %129 = vector.extract_strided_slice %53 {offsets = [16, 0], sizes = [40, 84], strides = [1, 1]} : vector<56x84xbf16> to vector<40x84xbf16>
    %c4_105 = arith.constant 4 : index
    %c0_106 = arith.constant 0 : index
    %c0_107 = arith.constant 0 : index
    %130 = vector.load %arg4[%c4_105, %c0_106, %c0_107] : memref<6x84x80xbf16, #tpu.memory_space<vmem>>, vector<1x84x80xbf16>
    %131 = vector.shape_cast %130 : vector<1x84x80xbf16> to vector<84x80xbf16>
    %cst_108 = arith.constant dense<0.000000e+00> : vector<40x80xf32>
    %132 = tpu.matmul %129, %131, %cst_108 {dimension_numbers = #tpu.dot_dimension_numbers<[1], [0], [0], [1], [0, 0, 1, 1], [], []>} : vector<40x84xbf16>, vector<84x80xbf16>, vector<40x80xf32> -> vector<40x80xf32>
    %133 = arith.addf %128, %132 : vector<40x80xf32>
    %134 = vector.extract_strided_slice %107 {offsets = [16, 0], sizes = [40, 84], strides = [1, 1]} : vector<56x84xbf16> to vector<40x84xbf16>
    %c5_109 = arith.constant 5 : index
    %c0_110 = arith.constant 0 : index
    %c0_111 = arith.constant 0 : index
    %135 = vector.load %arg4[%c5_109, %c0_110, %c0_111] : memref<6x84x80xbf16, #tpu.memory_space<vmem>>, vector<1x84x80xbf16>
    %136 = vector.shape_cast %135 : vector<1x84x80xbf16> to vector<84x80xbf16>
    %cst_112 = arith.constant dense<0.000000e+00> : vector<40x80xf32>
    %137 = tpu.matmul %134, %136, %cst_112 {dimension_numbers = #tpu.dot_dimension_numbers<[1], [0], [0], [1], [0, 0, 1, 1], [], []>} : vector<40x84xbf16>, vector<84x80xbf16>, vector<40x80xf32> -> vector<40x80xf32>
    %138 = arith.addf %133, %137 : vector<40x80xf32>
    %c0_113 = arith.constant 0 : index
    %c0_114 = arith.constant 0 : index
    %139 = vector.load %arg5[%c0_113, %c0_114] : memref<1x80xf32, #tpu.memory_space<vmem>>, vector<1x80xf32>
    %140 = vector.broadcast %139 : vector<1x80xf32> to vector<40x80xf32>
    %141 = arith.addf %138, %140 : vector<40x80xf32>
    %cst_115 = arith.constant 5.000000e-01 : f32
    %142 = vector.broadcast %cst_115 : f32 to vector<40x80xf32>
    %143 = arith.mulf %142, %141 : vector<40x80xf32>
    %144 = math.tanh %143 : vector<40x80xf32>
    %cst_116 = arith.constant 5.000000e-01 : f32
    %145 = vector.broadcast %cst_116 : f32 to vector<40x80xf32>
    %146 = arith.mulf %145, %144 : vector<40x80xf32>
    %cst_117 = arith.constant 5.000000e-01 : f32
    %147 = vector.broadcast %cst_117 : f32 to vector<40x80xf32>
    %148 = arith.addf %146, %147 : vector<40x80xf32>
    %149 = arith.truncf %148 : vector<40x80xf32> to vector<40x80xbf16>
    %cst_118 = arith.constant 0.000000e+00 : f32
    %150 = vector.broadcast %cst_118 : f32 to vector<8x120xf32>
    %151 = vector.extract_strided_slice %149 {offsets = [0, 0], sizes = [8, 80], strides = [1, 1]} : vector<40x80xbf16> to vector<8x80xbf16>
    %c0_119 = arith.constant 0 : index
    %c0_120 = arith.constant 0 : index
    %c0_121 = arith.constant 0 : index
    %152 = vector.load %arg6[%c0_119, %c0_120, %c0_121] : memref<5x80x120xbf16, #tpu.memory_space<vmem>>, vector<1x80x120xbf16>
    %153 = vector.shape_cast %152 : vector<1x80x120xbf16> to vector<80x120xbf16>
    %cst_122 = arith.constant dense<0.000000e+00> : vector<8x120xf32>
    %154 = tpu.matmul %151, %153, %cst_122 {dimension_numbers = #tpu.dot_dimension_numbers<[1], [0], [0], [1], [0, 0, 1, 1], [], []>} : vector<8x80xbf16>, vector<80x120xbf16>, vector<8x120xf32> -> vector<8x120xf32>
    %155 = arith.addf %150, %154 : vector<8x120xf32>
    %156 = vector.extract_strided_slice %149 {offsets = [8, 0], sizes = [8, 80], strides = [1, 1]} : vector<40x80xbf16> to vector<8x80xbf16>
    %c1_123 = arith.constant 1 : index
    %c0_124 = arith.constant 0 : index
    %c0_125 = arith.constant 0 : index
    %157 = vector.load %arg6[%c1_123, %c0_124, %c0_125] : memref<5x80x120xbf16, #tpu.memory_space<vmem>>, vector<1x80x120xbf16>
    %158 = vector.shape_cast %157 : vector<1x80x120xbf16> to vector<80x120xbf16>
    %cst_126 = arith.constant dense<0.000000e+00> : vector<8x120xf32>
    %159 = tpu.matmul %156, %158, %cst_126 {dimension_numbers = #tpu.dot_dimension_numbers<[1], [0], [0], [1], [0, 0, 1, 1], [], []>} : vector<8x80xbf16>, vector<80x120xbf16>, vector<8x120xf32> -> vector<8x120xf32>
    %160 = arith.addf %155, %159 : vector<8x120xf32>
    %161 = vector.extract_strided_slice %149 {offsets = [16, 0], sizes = [8, 80], strides = [1, 1]} : vector<40x80xbf16> to vector<8x80xbf16>
    %c2_127 = arith.constant 2 : index
    %c0_128 = arith.constant 0 : index
    %c0_129 = arith.constant 0 : index
    %162 = vector.load %arg6[%c2_127, %c0_128, %c0_129] : memref<5x80x120xbf16, #tpu.memory_space<vmem>>, vector<1x80x120xbf16>
    %163 = vector.shape_cast %162 : vector<1x80x120xbf16> to vector<80x120xbf16>
    %cst_130 = arith.constant dense<0.000000e+00> : vector<8x120xf32>
    %164 = tpu.matmul %161, %163, %cst_130 {dimension_numbers = #tpu.dot_dimension_numbers<[1], [0], [0], [1], [0, 0, 1, 1], [], []>} : vector<8x80xbf16>, vector<80x120xbf16>, vector<8x120xf32> -> vector<8x120xf32>
    %165 = arith.addf %160, %164 : vector<8x120xf32>
    %166 = vector.extract_strided_slice %149 {offsets = [24, 0], sizes = [8, 80], strides = [1, 1]} : vector<40x80xbf16> to vector<8x80xbf16>
    %c3_131 = arith.constant 3 : index
    %c0_132 = arith.constant 0 : index
    %c0_133 = arith.constant 0 : index
    %167 = vector.load %arg6[%c3_131, %c0_132, %c0_133] : memref<5x80x120xbf16, #tpu.memory_space<vmem>>, vector<1x80x120xbf16>
    %168 = vector.shape_cast %167 : vector<1x80x120xbf16> to vector<80x120xbf16>
    %cst_134 = arith.constant dense<0.000000e+00> : vector<8x120xf32>
    %169 = tpu.matmul %166, %168, %cst_134 {dimension_numbers = #tpu.dot_dimension_numbers<[1], [0], [0], [1], [0, 0, 1, 1], [], []>} : vector<8x80xbf16>, vector<80x120xbf16>, vector<8x120xf32> -> vector<8x120xf32>
    %170 = arith.addf %165, %169 : vector<8x120xf32>
    %171 = vector.extract_strided_slice %149 {offsets = [32, 0], sizes = [8, 80], strides = [1, 1]} : vector<40x80xbf16> to vector<8x80xbf16>
    %c4_135 = arith.constant 4 : index
    %c0_136 = arith.constant 0 : index
    %c0_137 = arith.constant 0 : index
    %172 = vector.load %arg6[%c4_135, %c0_136, %c0_137] : memref<5x80x120xbf16, #tpu.memory_space<vmem>>, vector<1x80x120xbf16>
    %173 = vector.shape_cast %172 : vector<1x80x120xbf16> to vector<80x120xbf16>
    %cst_138 = arith.constant dense<0.000000e+00> : vector<8x120xf32>
    %174 = tpu.matmul %171, %173, %cst_138 {dimension_numbers = #tpu.dot_dimension_numbers<[1], [0], [0], [1], [0, 0, 1, 1], [], []>} : vector<8x80xbf16>, vector<80x120xbf16>, vector<8x120xf32> -> vector<8x120xf32>
    %175 = arith.addf %170, %174 : vector<8x120xf32>
    %c0_139 = arith.constant 0 : index
    %c0_140 = arith.constant 0 : index
    %176 = vector.load %arg7[%c0_139, %c0_140] : memref<1x120xf32, #tpu.memory_space<vmem>>, vector<1x120xf32>
    %177 = vector.broadcast %176 : vector<1x120xf32> to vector<8x120xf32>
    %178 = arith.addf %175, %177 : vector<8x120xf32>
    %cst_141 = arith.constant 5.000000e-01 : f32
    %179 = vector.broadcast %cst_141 : f32 to vector<8x120xf32>
    %180 = arith.mulf %179, %178 : vector<8x120xf32>
    %181 = math.tanh %180 : vector<8x120xf32>
    %cst_142 = arith.constant 5.000000e-01 : f32
    %182 = vector.broadcast %cst_142 : f32 to vector<8x120xf32>
    %183 = arith.mulf %182, %181 : vector<8x120xf32>
    %cst_143 = arith.constant 5.000000e-01 : f32
    %184 = vector.broadcast %cst_143 : f32 to vector<8x120xf32>
    %185 = arith.addf %183, %184 : vector<8x120xf32>
    %186 = arith.truncf %185 : vector<8x120xf32> to vector<8x120xbf16>
    %c0_144 = arith.constant 0 : index
    %c0_145 = arith.constant 0 : index
    %187 = vector.load %arg8[%c0_144, %c0_145] : memref<120x84xbf16, #tpu.memory_space<vmem>>, vector<120x84xbf16>
    %cst_146 = arith.constant dense<0.000000e+00> : vector<8x84xf32>
    %188 = tpu.matmul %186, %187, %cst_146 {dimension_numbers = #tpu.dot_dimension_numbers<[1], [0], [0], [1], [0, 0, 1, 1], [], []>} : vector<8x120xbf16>, vector<120x84xbf16>, vector<8x84xf32> -> vector<8x84xf32>
    %c0_147 = arith.constant 0 : index
    %c0_148 = arith.constant 0 : index
    %189 = vector.load %arg9[%c0_147, %c0_148] : memref<1x84xf32, #tpu.memory_space<vmem>>, vector<1x84xf32>
    %190 = vector.broadcast %189 : vector<1x84xf32> to vector<8x84xf32>
    %191 = arith.addf %188, %190 : vector<8x84xf32>
    %cst_149 = arith.constant 5.000000e-01 : f32
    %192 = vector.broadcast %cst_149 : f32 to vector<8x84xf32>
    %193 = arith.mulf %192, %191 : vector<8x84xf32>
    %194 = math.tanh %193 : vector<8x84xf32>
    %cst_150 = arith.constant 5.000000e-01 : f32
    %195 = vector.broadcast %cst_150 : f32 to vector<8x84xf32>
    %196 = arith.mulf %195, %194 : vector<8x84xf32>
    %cst_151 = arith.constant 5.000000e-01 : f32
    %197 = vector.broadcast %cst_151 : f32 to vector<8x84xf32>
    %198 = arith.addf %196, %197 : vector<8x84xf32>
    %199 = arith.truncf %198 : vector<8x84xf32> to vector<8x84xbf16>
    %c0_152 = arith.constant 0 : index
    %c0_153 = arith.constant 0 : index
    %200 = vector.load %arg10[%c0_152, %c0_153] : memref<84x10xbf16, #tpu.memory_space<vmem>>, vector<84x10xbf16>
    %cst_154 = arith.constant dense<0.000000e+00> : vector<8x10xf32>
    %201 = tpu.matmul %199, %200, %cst_154 {dimension_numbers = #tpu.dot_dimension_numbers<[1], [0], [0], [1], [0, 0, 1, 1], [], []>} : vector<8x84xbf16>, vector<84x10xbf16>, vector<8x10xf32> -> vector<8x10xf32>
    %c0_155 = arith.constant 0 : index
    %c0_156 = arith.constant 0 : index
    %202 = vector.load %arg11[%c0_155, %c0_156] : memref<1x10xf32, #tpu.memory_space<vmem>>, vector<1x10xf32>
    %203 = vector.broadcast %202 : vector<1x10xf32> to vector<8x10xf32>
    %204 = arith.addf %201, %203 : vector<8x10xf32>
    %c0_157 = arith.constant 0 : index
    %c0_158 = arith.constant 0 : index
    %205 = vector.load %arg12[%c0_157, %c0_158] : memref<8x10xf32, #tpu.memory_space<vmem>>, vector<8x10xf32>
    tpu.vector_store %arg12[%c0_157, %c0_158], %204 {strides = array<i32>} : memref<8x10xf32, #tpu.memory_space<vmem>>, vector<8x10xf32>,
    return
  }
  func.func @transform_0(%arg0: i32) -> (i32, i32, i32) {
    %c0_i32 = arith.constant 0 : i32
    %c0_i32_0 = arith.constant 0 : i32
    %c0_i32_1 = arith.constant 0 : i32
    return %arg0, %c0_i32, %c0_i32_0 : i32, i32, i32
  }
  func.func @transform_1(%arg0: i32) -> (i32, i32, i32) {
    %c0_i32 = arith.constant 0 : i32
    %c0_i32_0 = arith.constant 0 : i32
    %c0_i32_1 = arith.constant 0 : i32
    %c0_i32_2 = arith.constant 0 : i32
    return %c0_i32, %c0_i32_0, %c0_i32_1 : i32, i32, i32
  }
  func.func @transform_2(%arg0: i32) -> (i32, i32) {
    %c0_i32 = arith.constant 0 : i32
    %c0_i32_0 = arith.constant 0 : i32
    %c0_i32_1 = arith.constant 0 : i32
    return %c0_i32, %c0_i32_0 : i32, i32
  }
  func.func @transform_3(%arg0: i32) -> (i32, i32, i32) {
    %c0_i32 = arith.constant 0 : i32
    %c0_i32_0 = arith.constant 0 : i32
    %c0_i32_1 = arith.constant 0 : i32
    %c0_i32_2 = arith.constant 0 : i32
    return %c0_i32, %c0_i32_0, %c0_i32_1 : i32, i32, i32
  }
  func.func @transform_4(%arg0: i32) -> (i32, i32) {
    %c0_i32 = arith.constant 0 : i32
    %c0_i32_0 = arith.constant 0 : i32
    %c0_i32_1 = arith.constant 0 : i32
    return %c0_i32, %c0_i32_0 : i32, i32
  }
  func.func @transform_5(%arg0: i32) -> (i32, i32, i32) {
    %c0_i32 = arith.constant 0 : i32
    %c0_i32_0 = arith.constant 0 : i32
    %c0_i32_1 = arith.constant 0 : i32
    %c0_i32_2 = arith.constant 0 : i32
    return %c0_i32, %c0_i32_0, %c0_i32_1 : i32, i32, i32
  }
  func.func @transform_6(%arg0: i32) -> (i32, i32) {
    %c0_i32 = arith.constant 0 : i32
    %c0_i32_0 = arith.constant 0 : i32
    %c0_i32_1 = arith.constant 0 : i32
    return %c0_i32, %c0_i32_0 : i32, i32
  }
  func.func @transform_7(%arg0: i32) -> (i32, i32) {
    %c0_i32 = arith.constant 0 : i32
    %c0_i32_0 = arith.constant 0 : i32
    %c0_i32_1 = arith.constant 0 : i32
    return %c0_i32, %c0_i32_0 : i32, i32
  }
  func.func @transform_8(%arg0: i32) -> (i32, i32) {
    %c0_i32 = arith.constant 0 : i32
    %c0_i32_0 = arith.constant 0 : i32
    %c0_i32_1 = arith.constant 0 : i32
    return %c0_i32, %c0_i32_0 : i32, i32
  }
  func.func @transform_9(%arg0: i32) -> (i32, i32) {
    %c0_i32 = arith.constant 0 : i32
    %c0_i32_0 = arith.constant 0 : i32
    %c0_i32_1 = arith.constant 0 : i32
    return %c0_i32, %c0_i32_0 : i32, i32
  }
  func.func @transform_10(%arg0: i32) -> (i32, i32) {
    %c0_i32 = arith.constant 0 : i32
    %c0_i32_0 = arith.constant 0 : i32
    %c0_i32_1 = arith.constant 0 : i32
    return %c0_i32, %c0_i32_0 : i32, i32
  }
  func.func @transform_11(%arg0: i32) -> (i32, i32) {
    %c0_i32 = arith.constant 0 : i32
    %c0_i32_0 = arith.constant 0 : i32
    return %arg0, %c0_i32 : i32, i32
  }
}

</mosaic_0001>

<bundles_post_ra>
// kernel: lenet5_forward.1
= control target key start
LH: loop header
LB: loop body
LE: loop exit
PB: predicated region body
PF: predicated region fallthrough
CT: control target
= control target key end

     0   :  { %vm83_vm0 = vcmask 261120   ;;  %vm887_vm1 = vcmask 1041408   ;;  %vm877_vm2 = vcmask 687104   ;;  %vm1432_vm3 = vcmask 654336   ;;  %s3256_s1 = inlined_call_operand.vmem [shape: bf16[6,32,84], index: 1, kind: input, shape index: {}]   ;;  %s3257_s0 = inlined_call_operand.vmem [shape: f32[4,64,32], index: 0, kind: input, shape index: {}]   ;;  %s3258_s2 = inlined_call_operand.vmem [shape: f32[1,84], index: 2, kind: input, shape index: {}]   ;;  %s3259_s3 = inlined_call_operand.vmem [shape: bf16[6,84,80], index: 3, kind: input, shape index: {}]   ;;  %s3260_s4 = inlined_call_operand.vmem [shape: f32[1,80], index: 4, kind: input, shape index: {}]   ;;  %s3261_s5 = inlined_call_operand.vmem [shape: bf16[5,80,120], index: 5, kind: input, shape index: {}]   ;;  %s3262_s6 = inlined_call_operand.vmem [shape: f32[1,120], index: 6, kind: input, shape index: {}]   ;;  %s3263_s8 = inlined_call_operand.vmem [shape: f32[1,84], index: 8, kind: input, shape index: {}]   ;;  %s3264_s7 = inlined_call_operand.vmem [shape: bf16[120,84], index: 7, kind: input, shape index: {}]   ;;  %s3265_s9 = inlined_call_operand.vmem [shape: bf16[84,10], index: 9, kind: input, shape index: {}]   ;;  %s3266_s10 = inlined_call_operand.vmem [shape: f32[1,10], index: 10, kind: input, shape index: {}]   ;;  %s3267_s11 = inlined_call_operand.vmem [shape: f32[8,10], index: 11, kind: output, shape index: {}]  }
   0x1   :  { %v2391_v0 = vld [vmem:[%s3256_s1 + $0x18] sm:$0xff]  ;;  %v2389_v1 = vld [vmem:[%s3256_s1 + $0x8] sm:$0xff]  ;;  %v2390_v4 = vld [vmem:[%s3256_s1 + $0x10] sm:$0xff]  ;;  %vm1747_vm4 = vcmask 1043456   ;;  %vm1743_vm5 = vcmask 982016   ;;  %vm1836_vm6 = vcmask 80896  }
   0x2   :  { %v2393_v2 = vld [vmem:[%s3256_s1 + $0x28] sm:$0xff]  ;;  %v2395_v3 = vld [vmem:[%s3256_s1 + $0x38] sm:$0xff]  ;;  %v2388_v5 = vld [vmem:[%s3256_s1] sm:$0xff]  ;;  %102 = vmatpush.bf16.msra.mxu0 %v2391_v0  ;;  %154 = vmatpush.bf16.msra.mxu1 %v2389_v1 }
   0x3   :  { %v2392_v6 = vld [vmem:[%s3256_s1 + $0x20] sm:$0xff]  ;;  %v2394_v7 = vld [vmem:[%s3256_s1 + $0x30] sm:$0xff]  ;;  %223 = vmatpush.bf16.msra.mxu2 %v2393_v2  ;;  %299 = vmatpush.bf16.msra.mxu3 %v2395_v3  ;;  %v2604_v9 = vld [vmem:[%s3257_s0 + $0x48] sm:$0xff] }
   0x4   :  { %v1842_v8 = vld [vmem:[%s3257_s0 + $0x40] sm:$0xff]  ;;  %v2612_v11 = vld [vmem:[%s3257_s0 + $0x8] sm:$0xff]  ;;  %v2399_v21 = vld [vmem:[%s3256_s1 + $0x58] sm:$0xff] }
   0x5   :  { %v39_v10 = vld [vmem:[%s3257_s0] sm:$0xff]  ;;  %v2620_v13 = vld [vmem:[%s3257_s0 + $0x88] sm:$0xff]  ;;  %v62_v15 = vpack.c.bf16 %v2604_v9, %v1842_v8  ;;  %v2398_v23 = vld [vmem:[%s3256_s1 + $0x50] sm:$0xff] }
   0x6   :  { %v1877_v12 = vld [vmem:[%s3257_s0 + $0x80] sm:$0xff]  ;;  %v46_v16 = vpack.c.bf16 %v2612_v11, %v39_v10  ;;  %v2630_v17 = vld [vmem:[%s3257_s0 + $0xc8] sm:$0xff]  ;;  %103 = vmatpush.bf16.msra.mxu0 %v2390_v4  ;;  %155 = vmatpush.bf16.msra.mxu1 %v2388_v5  ;;  %v1844_v24 = vld [vmem:[%s3257_s0 + $0x50] sm:$0xff] }
   0x7   :  { %v1900_v14 = vld [vmem:[%s3257_s0 + $0xc0] sm:$0xff]  ;;  %v2397_v18 = vld [vmem:[%s3256_s1 + $0x48] sm:$0xff]  ;;  %v2636_v19 = vpack.c.bf16 %v2620_v13, %v1877_v12  ;;  %224 = vmatpush.bf16.msra.mxu2 %v2392_v6  ;;  %300 = vmatpush.bf16.msra.mxu3 %v2394_v7  ;;  %v1845_v25 = vld [vmem:[%s3257_s0 + $0x58] sm:$0xff]  ;;  %v410_v57 = vpack.c.bf16 %v1844_v24, %v2604_v9 }
   0x8   :  { %v2639_v20 = vpack.c.bf16 %v2630_v17, %v1900_v14  ;;  %v2396_v22 = vld [vmem:[%s3256_s1 + $0x40] sm:$0xff]  ;;  %v41_v26 = vld [vmem:[%s3257_s0 + $0x10] sm:$0xff]  ;;  %v42_v27 = vld [vmem:[%s3257_s0 + $0x18] sm:$0xff]  ;;  %v63_v32 = vpack.c.bf16 %v1845_v25, %v1844_v24 }
   0x9   :  { %1861 = vmatmul.msk.bf16.vlgmr.msra.gmra.mxu0 %vm83_vm0, %v62_v15  ;;  %1873 = vmatmul.msk.bf16.vlgmr.msra.gmra.mxu1 %vm83_vm0, %v46_v16  ;;  %v2671_v28 = vld [vmem:[%s3257_s0 + $0x90] sm:$0xff]  ;;  %v2676_v29 = vld [vmem:[%s3257_s0 + $0x98] sm:$0xff]  ;;  %v47_v33 = vpack.c.bf16 %v42_v27, %v41_v26  ;;  %v1846_v36 = vld [vmem:[%s3257_s0 + $0x60] sm:$0xff]  ;;  %v335_v56 = vpack.c.bf16 %v41_v26, %v2612_v11 }
   0xa   :  { %374 = vmatpush.bf16.msrb.mxu0 %v2397_v18  ;;  %1896 = vmatmul.msk.bf16.vlgmr.msra.gmra.mxu2 %vm83_vm0, %v2636_v19  ;;  %v2681_v30 = vld [vmem:[%s3257_s0 + $0xd0] sm:$0xff]  ;;  %v2686_v31 = vld [vmem:[%s3257_s0 + $0xd8] sm:$0xff]  ;;  %v185_v34 = vpack.c.bf16 %v2676_v29, %v2671_v28  ;;  %v1847_v37 = vld [vmem:[%s3257_s0 + $0x68] sm:$0xff]  ;;  %v411_v59 = vpack.c.bf16 %v1846_v36, %v1845_v25 }
   0xb   :  { %530 = vmatpush.bf16.msrb.mxu2 %v2391_v0  ;;  %1919 = vmatmul.msk.bf16.vlgmr.msra.gmra.mxu3 %vm83_vm0, %v2639_v20  ;;  %v261_v35 = vpack.c.bf16 %v2686_v31, %v2681_v30  ;;  %v43_v38 = vld [vmem:[%s3257_s0 + $0x20] sm:$0xff]  ;;  %v44_v39 = vld [vmem:[%s3257_s0 + $0x28] sm:$0xff]  ;;  %v64_v44 = vpack.c.bf16 %v1847_v37, %v1846_v36  ;;  %v1848_v48 = vld [vmem:[%s3257_s0 + $0x70] sm:$0xff] }
   0xc   :  { %558 = vmatpush.bf16.msrb.mxu3 %v2389_v1  ;;  %449 = vmatpush.bf16.msrb.mxu1 %v2399_v21  ;;  %v2711_v40 = vld [vmem:[%s3257_s0 + $0xa0] sm:$0xff]  ;;  %v2716_v41 = vld [vmem:[%s3257_s0 + $0xa8] sm:$0xff]  ;;  %v48_v45 = vpack.c.bf16 %v44_v39, %v43_v38  ;;  %v45_v49 = vld [vmem:[%s3257_s0 + $0x30] sm:$0xff]  ;;  %v65_v52 = vpack.c.bf16 %v1848_v48, %v1848_v48  ;;  %v336_v58 = vpack.c.bf16 %v43_v38, %v42_v27 }
   0xd   :  { %v2721_v42 = vld [vmem:[%s3257_s0 + $0xe0] sm:$0xff]  ;;  %v2726_v43 = vld [vmem:[%s3257_s0 + $0xe8] sm:$0xff]  ;;  %v186_v46 = vpack.c.bf16 %v2716_v41, %v2711_v40  ;;  %v2745_v50 = vld [vmem:[%s3257_s0 + $0xb0] sm:$0xff]  ;;  %v49_v53 = vpack.c.bf16 %v45_v49, %v45_v49  ;;  %v337_v60 = vpack.c.bf16 %v45_v49, %v44_v39  ;;  %v412_v61 = vpack.c.bf16 %v1848_v48, %v1847_v37 }
   0xe   :  { %375 = vmatpush.bf16.msrb.mxu0 %v2396_v22  ;;  %v262_v47 = vpack.c.bf16 %v2726_v43, %v2721_v42  ;;  %v2750_v51 = vld [vmem:[%s3257_s0 + $0xf0] sm:$0xff]  ;;  %v187_v54 = vpack.c.bf16 %v2745_v50, %v2745_v50  ;;  %v334_v62 = vld [vmem:[%s3257_s0 + $0x38] sm:$0xff]  ;;  %v658_v15 = vpack.c.bf16 %v2711_v40, %v2676_v29  ;;  %v716_v16 = vpack.c.bf16 %v2721_v42, %v2686_v31  ;;  %v818_v27 = vld [vmem:[%s3259_s3 + $0x28] sm:$0x3] }
   0xf   :  { %531 = vmatpush.bf16.msrb.mxu2 %v2390_v4  ;;  %v263_v55 = vpack.c.bf16 %v2750_v51, %v2750_v51  ;;  %v1945_v63 = vld [vmem:[%s3257_s0 + $0x78] sm:$0xff]  ;;  %v2782_v0 = vpack.c.bf16 %v334_v62, %v334_v62  ;;  %v657_v4 = vpack.c.bf16 %v2671_v28, %v2620_v13  ;;  %v659_v25 = vpack.c.bf16 %v2745_v50, %v2716_v41  ;;  %v2404_v37 = vld [vmem:[%s3259_s3 + $0x20] sm:$0xff]  ;;  %v2402_v50 = vld [vmem:[%s3259_s3 + $0x10] sm:$0xff] }
  0x10   :  { %559 = vmatpush.bf16.msrb.mxu3 %v2388_v5  ;;  %450 = vmatpush.bf16.msrb.mxu1 %v2398_v23  ;;  %v2784_v1 = vpack.c.bf16 %v1945_v63, %v1945_v63  ;;  %v715_v5 = vpack.c.bf16 %v2681_v30, %v2630_v17  ;;  %v717_v26 = vpack.c.bf16 %v2750_v51, %v2726_v43  ;;  %v948_v30 = vunpack.c.l.b16 %v818_v27  ;;  %v1995_v36 = vld [vmem:[%s3257_s0 + $0xf8] sm:$0xff]  ;;  %v2067_v38 = vld [vmem:[%s3259_s3 + $0x80] sm:$0x3]  ;;  %v2412_v62 = vld [vmem:[%s3259_s3 + $0x68] sm:$0xff] }
  0x11   :  { %v1033_v41 = vunpack.c.l.b16 %v2067_v38  ;;  %v2403_v48 = vld [vmem:[%s3259_s3 + $0x18] sm:$0xff] }
  0x12   :  { %586 = vmatpush.bf16.msra.mxu0 %v2393_v2  ;;  %v2414_v51 = vld [vmem:[%s3259_s3 + $0x78] sm:$0xff] }
  0x13   :  { %679 = vmatpush.bf16.msra.mxu2 %v2397_v18 }
  0x14   :  { %737 = vmatpush.bf16.msra.mxu3 %v2399_v21  ;;  %621 = vmatpush.bf16.msra.mxu1 %v2395_v3 }
  0x16   :  { %587 = vmatpush.bf16.msra.mxu0 %v2392_v6 }
  0x17   :  { %680 = vmatpush.bf16.msra.mxu2 %v2396_v22 }
  0x18   :  { %738 = vmatpush.bf16.msra.mxu3 %v2398_v23  ;;  %622 = vmatpush.bf16.msra.mxu1 %v2394_v7 }
  0x19   :  { %1862 = vmatmul.msk.bf16.gmra.mxu0 %vm83_vm0, %v63_v32  ;;  %1874 = vmatmul.msk.bf16.gmra.mxu1 %vm83_vm0, %v47_v33  ;;  %v954_v33 = vpack.c.b16 %v948_v30, %v948_v30 }
  0x1a   :  { %1897 = vmatmul.msk.bf16.gmra.mxu2 %vm83_vm0, %v185_v34 }
  0x1b   :  { %1920 = vmatmul.msk.bf16.gmra.mxu3 %vm83_vm0, %v261_v35 }
  0x29   :  { %1863 = vmatmul.msk.bf16.gmra.mxu0 %vm83_vm0, %v64_v44  ;;  %1875 = vmatmul.msk.bf16.gmra.mxu1 %vm83_vm0, %v48_v45  ;;  %v718_v45 = vpack.c.bf16 %v1995_v36, %v1995_v36 }
  0x2a   :  { %1898 = vmatmul.msk.bf16.gmra.mxu2 %vm83_vm0, %v186_v46 }
  0x2b   :  { %1921 = vmatmul.msk.bf16.gmra.mxu3 %vm83_vm0, %v262_v47 }
  0x39   :  { %1864 = vmatmul.msk.bf16.gmra.mxu0 %vm83_vm0, %v65_v52  ;;  %1876 = vmatmul.msk.bf16.gmra.mxu1 %vm83_vm0, %v49_v53 }
  0x3a   :  { %1899 = vmatmul.msk.bf16.gmra.mxu2 %vm83_vm0, %v187_v54 }
  0x3b   :  { %1922 = vmatmul.msk.bf16.gmra.mxu3 %vm83_vm0, %v263_v55 }
  0x49   :  { %1935 = vmatmul.msk.bf16.vlgmr.msrb.gmra.mxu0 %vm83_vm0, %v335_v56  ;;  %1958 = vmatmul.msk.bf16.vlgmr.msrb.gmra.mxu1 %vm83_vm0, %v410_v57 }
  0x4a   :  { %1962 = vmatmul.msk.bf16.vlgmr.msrb.gmra.mxu2 %vm83_vm0, %v2639_v20 }
  0x4b   :  { %1966 = vmatmul.msk.bf16.vlgmr.msrb.gmra.mxu3 %vm83_vm0, %v2636_v19 }
  0x59   :  { %1936 = vmatmul.msk.bf16.gmra.mxu0 %vm83_vm0, %v336_v58  ;;  %1959 = vmatmul.msk.bf16.gmra.mxu1 %vm83_vm0, %v411_v59 }
  0x5a   :  { %1963 = vmatmul.msk.bf16.gmra.mxu2 %vm83_vm0, %v261_v35  ;;  %v1984_v35 = vld [vmem:[%s3257_s0 + $0xb8] sm:$0xff] }
  0x5b   :  { %1967 = vmatmul.msk.bf16.gmra.mxu3 %vm83_vm0, %v185_v34  ;;  %v970_v34 = vsel %vm887_vm1, %v954_v33, 0  ;;  %v660_v44 = vpack.c.bf16 %v1984_v35, %v1984_v35 }
  0x5c   :  { %974 = vmatpush.bf16.msrb.mxu1 %v970_v34 }
  0x60   :  { %975 = vmatpush.bf16.msrb.mxu1 %v2404_v37 }
  0x64   :  { %976 = vmatpush.bf16.msrb.mxu1 %v2403_v48 }
  0x68   :  { %977 = vmatpush.bf16.msrb.mxu1 %v2402_v50 }
  0x69   :  { %1937 = vmatmul.msk.bf16.gmra.mxu0 %vm83_vm0, %v337_v60  ;;  %1960 = vmatmul.msk.bf16.gmra.mxu1 %vm83_vm0, %v412_v61 }
  0x6a   :  { %1964 = vmatmul.msk.bf16.gmra.mxu2 %vm83_vm0, %v262_v47  ;;  %v1039_v47 = vpack.c.b16 %v1033_v41, %v1033_v41 }
  0x6b   :  { %1968 = vmatmul.msk.bf16.gmra.mxu3 %vm83_vm0, %v186_v46 }
  0x6c   :  { %v1055_v49 = vsel %vm887_vm1, %v1039_v47, 0 }
  0x6d   :  { %1059 = vmatpush.bf16.msrb.mxu2 %v1055_v49 }
  0x71   :  { %1060 = vmatpush.bf16.msrb.mxu2 %v2414_v51 }
  0x79   :  { %1938 = vmatmul.msk.bf16.gmra.mxu0 %vm83_vm0, %v2782_v0  ;;  %1961 = vmatmul.msk.bf16.gmra.mxu1 %vm83_vm0, %v2784_v1 }
  0x7a   :  { %1965 = vmatmul.msk.bf16.gmra.mxu2 %vm83_vm0, %v263_v55 }
  0x7b   :  { %1969 = vmatmul.msk.bf16.gmra.mxu3 %vm83_vm0, %v187_v54 }
  0x86   :  { %v105_v2 = vpop.f32.mrf.mxu0  ;;  %v157_v3 = vpop.f32.mrf.mxu1 }
  0x87   :  { %v2796_v6 = vadd.f32 %v157_v3, %v105_v2 }
  0x89   :  { %1970 = vmatmul.msk.bf16.vlgmr.msra.gmra.mxu0 %vm83_vm0, %v335_v56  ;;  %1974 = vmatmul.msk.bf16.vlgmr.msra.gmra.mxu1 %vm83_vm0, %v410_v57 }
  0x8a   :  { %1985 = vmatmul.msk.bf16.vlgmr.msra.gmra.mxu2 %vm83_vm0, %v657_v4 }
  0x8b   :  { %1996 = vmatmul.msk.bf16.vlgmr.msra.gmra.mxu3 %vm83_vm0, %v715_v5 }
  0x8d   :  { %v2802_v7 = vpop.f32.mrf.mxu2 }
  0x8e   :  { %v2804_v8 = vpop.f32.mrf.mxu3  ;;  %v2806_v9 = vpop.f32.mrf.mxu0 }
  0x8f   :  { %v2808_v10 = vpop.f32.mrf.mxu1 }
  0x90   :  { %v160_v4 = vadd.f32 %v2808_v10, %v2806_v9  ;;  %v2410_v9 = vld [vmem:[%s3259_s3 + $0x58] sm:$0xff] }
  0x95   :  { %v2810_v11 = vpop.f32.mrf.mxu2 }
  0x96   :  { %v2812_v12 = vpop.f32.mrf.mxu3  ;;  %v2814_v13 = vpop.f32.mrf.mxu0 }
  0x97   :  { %v2816_v14 = vpop.f32.mrf.mxu1 }
  0x99   :  { %1971 = vmatmul.msk.bf16.gmra.mxu0 %vm83_vm0, %v336_v58  ;;  %1975 = vmatmul.msk.bf16.gmra.mxu1 %vm83_vm0, %v411_v59  ;;  %v2401_v58 = vld [vmem:[%s3259_s3 + $0x8] sm:$0xff]  ;;  %v2413_v59 = vld [vmem:[%s3259_s3 + $0x70] sm:$0xff] }
  0x9a   :  { %1986 = vmatmul.msk.bf16.gmra.mxu2 %vm83_vm0, %v658_v15  ;;  %978 = vmatpush.bf16.msrb.mxu1 %v2401_v58 }
  0x9b   :  { %1997 = vmatmul.msk.bf16.gmra.mxu3 %vm83_vm0, %v716_v16  ;;  %1061 = vmatpush.bf16.msrb.mxu2 %v2413_v59 }
  0x9d   :  { %v2826_v17 = vpop.f32.mrf.mxu2 }
  0x9e   :  { %v2828_v18 = vpop.f32.mrf.mxu3  ;;  %v2830_v19 = vpop.f32.mrf.mxu0 }
  0x9f   :  { %v2832_v20 = vpop.f32.mrf.mxu1  ;;  %1062 = vmatpush.bf16.msrb.mxu2 %v2412_v62 }
  0xa5   :  { %v2834_v21 = vpop.f32.mrf.mxu2 }
  0xa6   :  { %v2836_v22 = vpop.f32.mrf.mxu3  ;;  %v2838_v23 = vpop.f32.mrf.mxu0 }
  0xa7   :  { %v2840_v24 = vpop.f32.mrf.mxu1 }
  0xa9   :  { %1972 = vmatmul.msk.bf16.gmra.mxu0 %vm83_vm0, %v337_v60  ;;  %1976 = vmatmul.msk.bf16.gmra.mxu1 %vm83_vm0, %v412_v61  ;;  %v245_v60 = vadd.f32 %v2802_v7, %v2796_v6  ;;  %v2400_v61 = vld [vmem:[%s3259_s3] sm:$0xff] }
  0xaa   :  { %1987 = vmatmul.msk.bf16.gmra.mxu2 %vm83_vm0, %v659_v25  ;;  %v2916_v6 = vld [vmem:[%s3258_s2] ss:$0 sm:$0xff]  ;;  %979 = vmatpush.bf16.msrb.mxu1 %v2400_v61 }
  0xab   :  { %1998 = vmatmul.msk.bf16.gmra.mxu3 %vm83_vm0, %v717_v26  ;;  %v321_v63 = vadd.f32 %v2804_v8, %v245_v60  ;;  %v2411_v7 = vld [vmem:[%s3259_s3 + $0x60] sm:$0xff]  ;;  %v246_v8 = vadd.f32 %v2810_v11, %v160_v4  ;;  %v163_v11 = vadd.f32 %v2816_v14, %v2814_v13  ;;  %v165_v13 = vadd.f32 %v2832_v20, %v2830_v19 }
  0xac   :  { %1063 = vmatpush.bf16.msrb.mxu2 %v2411_v7  ;;  %v168_v20 = vadd.f32 %v2840_v24, %v2838_v23 }
  0xad   :  { %v2853_v28 = vpop.f32.mrf.mxu2  ;;  %v322_v10 = vadd.f32 %v2812_v12, %v246_v8  ;;  %v247_v36 = vadd.f32 %v2826_v17, %v163_v11  ;;  %v248_v17 = vadd.f32 %v2834_v21, %v165_v13 }
  0xae   :  { %v2855_v29 = vpop.f32.mrf.mxu3  ;;  %v2857_v31 = vpop.f32.mrf.mxu0  ;;  %v249_v60 = vadd.f32 %v2853_v28, %v168_v20 }
  0xaf   :  { %v2859_v32 = vpop.f32.mrf.mxu1  ;;  %v323_v12 = vadd.f32 %v2828_v18, %v247_v36  ;;  %v324_v51 = vadd.f32 %v2836_v22, %v248_v17 }
  0xb0   :  { %1064 = vmatpush.bf16.msrb.mxu2 %v2410_v9 }
  0xb5   :  { %v2874_v39 = vpop.f32.mrf.mxu2 }
  0xb6   :  { %v2876_v40 = vpop.f32.mrf.mxu3  ;;  %v120_v42 = vpop.f32.mrf.mxu0 }
  0xb7   :  { %v172_v43 = vpop.f32.mrf.mxu1 }
  0xb8   :  { %v173_v46 = vadd.f32 %v172_v43, %v120_v42 }
  0xb9   :  { %1973 = vmatmul.msk.bf16.gmra.mxu0 %vm83_vm0, %v2782_v0  ;;  %1977 = vmatmul.msk.bf16.gmra.mxu1 %vm83_vm0, %v2784_v1 }
  0xba   :  { %1988 = vmatmul.msk.bf16.gmra.mxu2 %vm83_vm0, %v660_v44 }
  0xbb   :  { %1999 = vmatmul.msk.bf16.gmra.mxu3 %vm83_vm0, %v718_v45 }
  0xbd   :  { %v241_v52 = vpop.f32.mrf.mxu2 }
  0xbe   :  { %v317_v53 = vpop.f32.mrf.mxu3  ;;  %v251_v54 = vadd.f32 %v241_v52, %v173_v46  ;;  %v122_v55 = vpop.f32.mrf.mxu0 }
  0xbf   :  { %v174_v56 = vpop.f32.mrf.mxu1 }
  0xc0   :  { %v2894_v57 = vadd.f32 %v317_v53, %v251_v54 }
  0xc5   :  { %v243_v0 = vpop.f32.mrf.mxu2 }
  0xc6   :  { %v319_v1 = vpop.f32.mrf.mxu3  ;;  %v377_v2 = vpop.f32.mrf.mxu0 }
  0xc7   :  { %v452_v3 = vpop.f32.mrf.mxu1  ;;  %v396_v5 = vadd.f32 %v377_v2, %v321_v63  ;;  %v2010_v1 = vld [vmem:[%s3259_s3 + $0x54] sm:$0x3] }
  0xc8   :  { %v865_v28 = vunpack.c.l.b16 %v2010_v1 }
  0xc9   :  { %v471_v15 = vadd.f32 %v452_v3, %v396_v5  ;;  %v325_v3 = vadd.f32 %v2855_v29, %v249_v60 }
  0xcb   :  { %v482_v16 = vadd.f32 %v2916_v6, %v471_v15 }
  0xcd   :  { %v489_v25 = vmul.f32 0.5, %v482_v16  ;;  %v533_v26 = vpop.f32.mrf.mxu2  ;;  %v170_v16 = vadd.f32 %v2859_v32, %v2857_v31 }
  0xce   :  { %v561_v27 = vpop.f32.mrf.mxu3  ;;  %v379_v33 = vpop.f32.mrf.mxu0 }
  0xcf   :  { %v2927_v30 = vadd.f32 %v561_v27, %v533_v26  ;;  %v454_v34 = vpop.f32.mrf.mxu1  ;;  %2472 = vtanh.f32 %v489_v25  ;;  %v397_v35 = vadd.f32 %v379_v33, %v322_v10  ;;  %v871_v10 = vpack.c.b16 %v865_v28, %v865_v28 }
  0xd0   :  { %v250_v29 = vadd.f32 %v2874_v39, %v170_v16  ;;  %v2169_v16 = vld [vmem:[%s3259_s3 + $0x104] sm:$0x3] }
  0xd1   :  { %v472_v37 = vadd.f32 %v454_v34, %v397_v35  ;;  %v889_v27 = vsel %vm887_vm1, %v871_v10, 0 }
  0xd2   :  { %893 = vmatpush.bf16.msrb.mxu0 %v889_v27  ;;  %v326_v36 = vadd.f32 %v2876_v40, %v250_v29  ;;  %v2408_v40 = vld [vmem:[%s3259_s3 + $0x44] sm:$0xff] }
  0xd3   :  { %v483_v38 = vadd.f32 %v2916_v6, %v472_v37 }
  0xd5   :  { %v2473_v41 = vpop.eup %2472  ;;  %v490_v42 = vmul.f32 0.5, %v483_v38  ;;  %v2934_v43 = vpop.f32.mrf.mxu2 }
  0xd6   :  { %v2936_v44 = vpop.f32.mrf.mxu3  ;;  %v382_v45 = vpop.f32.mrf.mxu0  ;;  %v503_v47 = vmul.f32 0.5, %v2473_v41 }
  0xd7   :  { %v457_v46 = vpop.f32.mrf.mxu1  ;;  %2474 = vtanh.f32 %v490_v42  ;;  %v398_v14 = vadd.f32 %v382_v45, %v323_v12  ;;  %v2409_v42 = vld [vmem:[%s3259_s3 + $0x4c] sm:$0xff] }
  0xd8   :  { %v510_v50 = vadd.f32 0.5, %v503_v47  ;;  %894 = vmatpush.bf16.msrb.mxu0 %v2409_v42 }
  0xd9   :  { %v473_v48 = vadd.f32 %v457_v46, %v398_v14 }
  0xda   :  { %v517_v58 = vpack.c.bf16 %v510_v50, %v510_v50 }
  0xdb   :  { %v484_v49 = vadd.f32 %v2916_v6, %v473_v48 }
  0xdc   :  { %v919_v63 = vunpack.c.l.b16 %v517_v58  ;;  %895 = vmatpush.bf16.msrb.mxu0 %v2408_v40 }
  0xdd   :  { %v2475_v18 = vpop.eup %2474  ;;  %v491_v52 = vmul.f32 0.5, %v484_v49  ;;  %v2943_v53 = vpop.f32.mrf.mxu2 }
  0xde   :  { %v2945_v54 = vpop.f32.mrf.mxu3  ;;  %v504_v55 = vmul.f32 0.5, %v2475_v18  ;;  %v384_v56 = vpop.f32.mrf.mxu0 }
  0xdf   :  { %v459_v19 = vpop.f32.mrf.mxu1  ;;  %2476 = vtanh.f32 %v491_v52  ;;  %v399_v21 = vadd.f32 %v384_v56, %v324_v51 }
  0xe0   :  { %v511_v59 = vadd.f32 0.5, %v504_v55 }
  0xe1   :  { %v474_v61 = vadd.f32 %v459_v19, %v399_v21 }
  0xe2   :  { %v518_v62 = vpack.c.bf16 %v511_v59, %v511_v59  ;;  %v2101_v59 = vld [vmem:[%s3259_s3 + $0xac] sm:$0x3] }
  0xe3   :  { %v485_v22 = vadd.f32 %v2916_v6, %v474_v61  ;;  %v1123_v60 = vunpack.c.l.b16 %v2101_v59  ;;  %v567_v59 = vadd.f32 %v2945_v54, %v2943_v53 }
  0xe4   :  { %v920_v0 = vunpack.c.l.b16 %v518_v62 }
  0xe5   :  { %v2477_v2 = vpop.eup %2476  ;;  %v492_v23 = vmul.f32 0.5, %v485_v22  ;;  %v2955_v24 = vpop.f32.mrf.mxu2 }
  0xe6   :  { %v2957_v4 = vpop.f32.mrf.mxu3  ;;  %v924_v5 = vpack.c.b16 %v920_v0, %v919_v63  ;;  %v505_v7 = vmul.f32 0.5, %v2477_v2  ;;  %v387_v8 = vpop.f32.mrf.mxu0 }
  0xe7   :  { %v462_v15 = vpop.f32.mrf.mxu1  ;;  %2478 = vtanh.f32 %v492_v23  ;;  %v400_v9 = vadd.f32 %v387_v8, %v325_v3  ;;  %v2407_v8 = vld [vmem:[%s3259_s3 + $0x3c] sm:$0xff] }
  0xe8   :  { %v512_v25 = vadd.f32 0.5, %v505_v7  ;;  %2054 = vmatmul.msk.bf16.vlgmr.msrb.gmra.mxu1 %vm877_vm2, %v924_v5  ;;  %896 = vmatpush.bf16.msrb.mxu0 %v2407_v8 }
  0xe9   :  { %v475_v26 = vadd.f32 %v462_v15, %v400_v9  ;;  %v2419_v15 = vld [vmem:[%s3259_s3 + $0xa4] sm:$0xff]  ;;  %v1298_v9 = vunpack.c.l.b16 %v2169_v16 }
  0xea   :  { %v519_v33 = vpack.c.bf16 %v512_v25, %v512_v25 }
  0xeb   :  { %v486_v34 = vadd.f32 %v2916_v6, %v475_v26  ;;  %v1304_v26 = vpack.c.b16 %v1298_v9, %v1298_v9 }
  0xec   :  { %v921_v11 = vunpack.c.l.b16 %v519_v33 }
  0xed   :  { %v2479_v35 = vpop.eup %2478  ;;  %v493_v31 = vmul.f32 0.5, %v486_v34  ;;  %v2966_v32 = vpop.f32.mrf.mxu2 }
  0xee   :  { %v2968_v37 = vpop.f32.mrf.mxu3  ;;  %v1009_v38 = vpack.c.b16 %v921_v11, %v920_v0  ;;  %v506_v41 = vmul.f32 0.5, %v2479_v35  ;;  %v389_v12 = vpop.f32.mrf.mxu0  ;;  %v1129_v0 = vpack.c.b16 %v1123_v60, %v1123_v60  ;;  %v2418_v35 = vld [vmem:[%s3259_s3 + $0x9c] sm:$0xff] }
  0xef   :  { %v464_v39 = vpop.f32.mrf.mxu1  ;;  %2480 = vtanh.f32 %v493_v31  ;;  %v401_v45 = vadd.f32 %v389_v12, %v326_v36  ;;  %v1317_v31 = vsel %vm887_vm1, %v1304_v26, 0  ;;  %v2417_v12 = vld [vmem:[%s3259_s3 + $0x94] sm:$0xff] }
  0xf0   :  { %v513_v46 = vadd.f32 0.5, %v506_v41  ;;  %2088 = vmatmul.msk.bf16.vlgmr.msrb.gmra.mxu2 %vm877_vm2, %v1009_v38  ;;  %v1145_v28 = vsel %vm887_vm1, %v1129_v0, 0  ;;  %1321 = vmatpush.bf16.msra.mxu1 %v1317_v31  ;;  %v2405_v41 = vld [vmem:[%s3259_s3 + $0x2c] sm:$0xff] }
  0xf1   :  { %v476_v13 = vadd.f32 %v464_v39, %v401_v45  ;;  %1149 = vmatpush.bf16.msrb.mxu3 %v1145_v28  ;;  %v2429_v39 = vld [vmem:[%s3259_s3 + $0xfc] sm:$0xff] }
  0xf2   :  { %v520_v14 = vpack.c.bf16 %v513_v46, %v513_v46  ;;  %v564_v46 = vadd.f32 %v2936_v44, %v2934_v43  ;;  %v2415_v44 = vld [vmem:[%s3259_s3 + $0x84] sm:$0xff] }
  0xf3   :  { %v487_v47 = vadd.f32 %v2916_v6, %v476_v13 }
  0xf4   :  { %v922_v17 = vunpack.c.l.b16 %v520_v14  ;;  %1322 = vmatpush.bf16.msra.mxu1 %v2429_v39 }
  0xf5   :  { %v2481_v48 = vpop.eup %2480  ;;  %v494_v49 = vmul.f32 0.5, %v487_v47  ;;  %v2978_v50 = vpop.f32.mrf.mxu2  ;;  %1150 = vmatpush.bf16.msrb.mxu3 %v2419_v15 }
  0xf6   :  { %v2980_v18 = vpop.f32.mrf.mxu3  ;;  %v507_v51 = vmul.f32 0.5, %v2481_v48  ;;  %v392_v52 = vpop.f32.mrf.mxu0  ;;  %v2982_v56 = vpack.c.b16 %v922_v17, %v921_v11  ;;  %v2406_v11 = vld [vmem:[%s3259_s3 + $0x34] sm:$0xff] }
  0xf7   :  { %v467_v55 = vpop.f32.mrf.mxu1  ;;  %2482 = vtanh.f32 %v494_v49  ;;  %v402_v19 = vadd.f32 %v392_v52, %v2894_v57  ;;  %897 = vmatpush.bf16.msrb.mxu0 %v2406_v11  ;;  %v2428_v48 = vld [vmem:[%s3259_s3 + $0xf4] sm:$0xff]  ;;  %v2427_v52 = vld [vmem:[%s3259_s3 + $0xec] sm:$0xff] }
  0xf8   :  { %v514_v20 = vadd.f32 0.5, %v507_v51  ;;  %2055 = vmatmul.msk.bf16.gmra.mxu1 %vm877_vm2, %v2982_v56 }
  0xf9   :  { %v2987_v21 = vadd.f32 %v467_v55, %v402_v19  ;;  %1151 = vmatpush.bf16.msrb.mxu3 %v2418_v35  ;;  %1323 = vmatpush.bf16.msra.mxu1 %v2428_v48  ;;  %v2424_v48 = vld [vmem:[%s3259_s3 + $0xd0] sm:$0xff] }
  0xfa   :  { %v521_v58 = vpack.c.bf16 %v514_v20, %v514_v20 }
  0xfb   :  { %898 = vmatpush.bf16.msrb.mxu0 %v2405_v41 }
  0xfc   :  { %v2992_v61 = vunpack.c.l.b16 %v521_v58 }
  0xfd   :  { %v2483_v62 = vpop.eup %2482  ;;  %v548_v22 = vpop.f32.mrf.mxu2  ;;  %1152 = vmatpush.bf16.msrb.mxu3 %v2417_v12  ;;  %1324 = vmatpush.bf16.msra.mxu1 %v2427_v52  ;;  %v572_v12 = vadd.f32 %v2968_v37, %v2966_v32 }
  0xfe   :  { %v576_v63 = vpop.f32.mrf.mxu3  ;;  %v508_v1 = vmul.f32 0.5, %v2483_v62  ;;  %v394_v2 = vpop.f32.mrf.mxu0  ;;  %v1010_v23 = vpack.c.b16 %v2992_v61, %v922_v17  ;;  %v926_v34 = vpack.c.b16 %v2992_v61, %v2992_v61  ;;  %v2416_v17 = vld [vmem:[%s3259_s3 + $0x8c] sm:$0xff] }
  0xff   :  { %v2994_v57 = vadd.f32 %v576_v63, %v548_v22  ;;  %v469_v3 = vpop.f32.mrf.mxu1  ;;  %v2426_v63 = vld [vmem:[%s3259_s3 + $0xe4] sm:$0xff] }
 0x100   :  { %v515_v5 = vadd.f32 0.5, %v508_v1  ;;  %2089 = vmatmul.msk.bf16.gmra.mxu2 %vm877_vm2, %v1010_v23  ;;  %v2425_v3 = vld [vmem:[%s3259_s3 + $0xdc] sm:$0xff] }
 0x101   :  { %1153 = vmatpush.bf16.msrb.mxu3 %v2416_v17  ;;  %1325 = vmatpush.bf16.msra.mxu1 %v2426_v63 }
 0x102   :  { %v522_v7 = vpack.c.bf16 %v515_v5, %v515_v5 }
 0x104   :  { %v3008_v10 = vunpack.c.l.b16 %v522_v7  ;;  %v569_v7 = vadd.f32 %v2957_v4, %v2955_v24 }
 0x105   :  { %v550_v25 = vpop.f32.mrf.mxu2  ;;  %1154 = vmatpush.bf16.msrb.mxu3 %v2415_v44  ;;  %1326 = vmatpush.bf16.msra.mxu1 %v2425_v3 }
 0x106   :  { %v578_v29 = vpop.f32.mrf.mxu3  ;;  %v589_v27 = vpop.f32.mrf.mxu0  ;;  %v1189_v36 = vpack.c.b16 %v3008_v10, %v2992_v61  ;;  %v1011_v47 = vpack.c.b16 %v3008_v10, %v3008_v10  ;;  %v2439_v61 = vld [vmem:[%s3261_s5 + $0x48] sm:$0xff] }
 0x107   :  { %v624_v33 = vpop.f32.mrf.mxu1  ;;  %v608_v38 = vadd.f32 %v589_v27, %v2927_v30  ;;  %v2135_v27 = vld [vmem:[%s3259_s3 + $0xd8] sm:$0x3]  ;;  %1439 = vmatpush.bf16.msra.mxu2 %v2439_v61 }
 0x108   :  { %2056 = vmatmul.msk.bf16.gmra.mxu1 %vm877_vm2, %v926_v34  ;;  %v1212_v34 = vunpack.c.l.b16 %v2135_v27  ;;  %v2420_v27 = vld [vmem:[%s3259_s3 + $0xb0] sm:$0xff] }
 0x109   :  { %v643_v42 = vadd.f32 %v624_v33, %v608_v38 }
 0x10a   :  { %v1218_v41 = vpack.c.b16 %v1212_v34, %v1212_v34 }
 0x10d   :  { %v682_v30 = vpop.f32.mrf.mxu2 }
 0x10e   :  { %v740_v45 = vpop.f32.mrf.mxu3  ;;  %v701_v40 = vadd.f32 %v682_v30, %v643_v42  ;;  %v591_v13 = vpop.f32.mrf.mxu0 }
 0x10f   :  { %v626_v14 = vpop.f32.mrf.mxu1  ;;  %v609_v51 = vadd.f32 %v591_v13, %v564_v46 }
 0x110   :  { %v759_v49 = vadd.f32 %v740_v45, %v701_v40  ;;  %2090 = vmatmul.msk.bf16.gmra.mxu2 %vm877_vm2, %v1011_v47  ;;  %v1231_v40 = vsel %vm887_vm1, %v1218_v41, 0 }
 0x111   :  { %v644_v19 = vadd.f32 %v626_v14, %v609_v51  ;;  %1235 = vmatpush.bf16.msra.mxu0 %v1231_v40 }
 0x112   :  { %v766_v43 = vadd.f32 %v2916_v6, %v759_v49 }
 0x114   :  { %v773_v55 = vmul.f32 0.5, %v766_v43 }
 0x115   :  { %v684_v20 = vpop.f32.mrf.mxu2  ;;  %1236 = vmatpush.bf16.msra.mxu0 %v2424_v48 }
 0x116   :  { %v742_v58 = vpop.f32.mrf.mxu3  ;;  %2484 = vtanh.f32 %v773_v55  ;;  %v702_v60 = vadd.f32 %v684_v20, %v644_v19  ;;  %v594_v62 = vpop.f32.mrf.mxu0  ;;  %v574_v20 = vadd.f32 %v2980_v18, %v2978_v50  ;;  %v2422_v50 = vld [vmem:[%s3259_s3 + $0xc0] sm:$0xff] }
 0x117   :  { %v629_v22 = vpop.f32.mrf.mxu1  ;;  %v610_v1 = vadd.f32 %v594_v62, %v567_v59  ;;  %v2423_v62 = vld [vmem:[%s3259_s3 + $0xc8] sm:$0xff] }
 0x118   :  { %v760_v0 = vadd.f32 %v742_v58, %v702_v60 }
 0x119   :  { %v645_v53 = vadd.f32 %v629_v22, %v610_v1  ;;  %1237 = vmatpush.bf16.msra.mxu0 %v2423_v62  ;;  %v488_v62 = vadd.f32 %v2916_v6, %v2987_v21 }
 0x11a   :  { %v767_v2 = vadd.f32 %v2916_v6, %v760_v0 }
 0x11c   :  { %v2485_v23 = vpop.eup %2484  ;;  %v774_v28 = vmul.f32 0.5, %v767_v2 }
 0x11d   :  { %v687_v54 = vpop.f32.mrf.mxu2  ;;  %v787_v9 = vmul.f32 0.5, %v2485_v23  ;;  %1238 = vmatpush.bf16.msra.mxu0 %v2422_v50 }
 0x11e   :  { %v745_v5 = vpop.f32.mrf.mxu3  ;;  %2486 = vtanh.f32 %v774_v28  ;;  %v703_v8 = vadd.f32 %v687_v54, %v645_v53  ;;  %v596_v15 = vpop.f32.mrf.mxu0 }
 0x11f   :  { %v631_v16 = vpop.f32.mrf.mxu1  ;;  %v611_v29 = vadd.f32 %v596_v15, %v569_v7  ;;  %v794_v33 = vadd.f32 0.5, %v787_v9 }
 0x120   :  { %v761_v25 = vadd.f32 %v745_v5, %v703_v8  ;;  %v2421_v8 = vld [vmem:[%s3259_s3 + $0xb8] sm:$0xff] }
 0x121   :  { %v646_v31 = vadd.f32 %v631_v16, %v611_v29  ;;  %v801_v45 = vpack.c.bf16 %v794_v33, %v794_v33  ;;  %1239 = vmatpush.bf16.msra.mxu0 %v2421_v8 }
 0x122   :  { %v768_v26 = vadd.f32 %v2916_v6, %v761_v25 }
 0x123   :  { %v836_v49 = vunpack.c.l.b16 %v801_v45 }
 0x124   :  { %v2487_v11 = vpop.eup %2486  ;;  %v775_v35 = vmul.f32 0.5, %v768_v26 }
 0x125   :  { %v788_v38 = vmul.f32 0.5, %v2487_v11  ;;  %v689_v24 = vpop.f32.mrf.mxu2  ;;  %1240 = vmatpush.bf16.msra.mxu0 %v2420_v27 }
 0x126   :  { %v747_v4 = vpop.f32.mrf.mxu3  ;;  %2488 = vtanh.f32 %v775_v35  ;;  %v704_v39 = vadd.f32 %v689_v24, %v646_v31  ;;  %v599_v42 = vpop.f32.mrf.mxu0 }
 0x127   :  { %v634_v30 = vpop.f32.mrf.mxu1  ;;  %v795_v46 = vadd.f32 0.5, %v788_v38  ;;  %v612_v14 = vadd.f32 %v599_v42, %v572_v12 }
 0x128   :  { %v762_v13 = vadd.f32 %v747_v4, %v704_v39 }
 0x129   :  { %v802_v47 = vpack.c.bf16 %v795_v46, %v795_v46  ;;  %v647_v43 = vadd.f32 %v634_v30, %v612_v14 }
 0x12a   :  { %v769_v17 = vadd.f32 %v2916_v6, %v762_v13 }
 0x12b   :  { %v837_v32 = vunpack.c.l.b16 %v802_v47 }
 0x12c   :  { %v2489_v37 = vpop.eup %2488  ;;  %v776_v51 = vmul.f32 0.5, %v769_v17 }
 0x12d   :  { %v841_v44 = vpack.c.b16 %v837_v32, %v836_v49  ;;  %v789_v52 = vmul.f32 0.5, %v2489_v37  ;;  %v692_v55 = vpop.f32.mrf.mxu2 }
 0x12e   :  { %v750_v19 = vpop.f32.mrf.mxu3  ;;  %2490 = vtanh.f32 %v776_v51  ;;  %v705_v58 = vadd.f32 %v692_v55, %v647_v43  ;;  %v601_v59 = vpop.f32.mrf.mxu0 }
 0x12f   :  { %v636_v60 = vpop.f32.mrf.mxu1  ;;  %v796_v22 = vadd.f32 0.5, %v789_v52  ;;  %2031 = vmatmul.msk.bf16.vlgmr.msrb.gmra.mxu0 %vm877_vm2, %v841_v44  ;;  %v613_v63 = vadd.f32 %v601_v59, %v574_v20 }
 0x130   :  { %v763_v0 = vadd.f32 %v750_v19, %v705_v58 }
 0x131   :  { %v803_v1 = vpack.c.bf16 %v796_v22, %v796_v22  ;;  %v648_v28 = vadd.f32 %v636_v60, %v613_v63  ;;  %v495_v63 = vmul.f32 0.5, %v488_v62 }
 0x132   :  { %v770_v2 = vadd.f32 %v2916_v6, %v763_v0 }
 0x133   :  { %v838_v18 = vunpack.c.l.b16 %v803_v1 }
 0x134   :  { %v2491_v3 = vpop.eup %2490  ;;  %v777_v23 = vmul.f32 0.5, %v770_v2 }
 0x135   :  { %v1099_v53 = vpack.c.b16 %v838_v18, %v837_v32  ;;  %v790_v54 = vmul.f32 0.5, %v2491_v3  ;;  %v694_v5 = vpop.f32.mrf.mxu2 }
 0x136   :  { %v752_v7 = vpop.f32.mrf.mxu3  ;;  %2492 = vtanh.f32 %v777_v23  ;;  %v706_v15 = vadd.f32 %v694_v5, %v648_v28  ;;  %v604_v16 = vpop.f32.mrf.mxu0 }
 0x137   :  { %v639_v9 = vpop.f32.mrf.mxu1  ;;  %v797_v25 = vadd.f32 0.5, %v790_v54  ;;  %2122 = vmatmul.msk.bf16.vlgmr.msrb.gmra.mxu3 %vm877_vm2, %v1099_v53  ;;  %v614_v29 = vadd.f32 %v604_v16, %v2994_v57 }
 0x138   :  { %v764_v26 = vadd.f32 %v752_v7, %v706_v15 }
 0x139   :  { %v804_v33 = vpack.c.bf16 %v797_v25, %v797_v25  ;;  %v649_v38 = vadd.f32 %v639_v9, %v614_v29  ;;  %v2438_v29 = vld [vmem:[%s3261_s5 + $0x40] sm:$0xff] }
 0x13a   :  { %v771_v34 = vadd.f32 %v2916_v6, %v764_v26  ;;  %v2434_v26 = vld [vmem:[%s3261_s5 + $0x20] sm:$0xff]  ;;  %1440 = vmatpush.bf16.msra.mxu2 %v2438_v29 }
 0x13b   :  { %v839_v11 = vunpack.c.l.b16 %v804_v33  ;;  %1485 = vmatpush.bf16.msra.mxu3 %v2434_v26 }
 0x13c   :  { %v2493_v35 = vpop.eup %2492  ;;  %v778_v31 = vmul.f32 0.5, %v771_v34 }
 0x13d   :  { %v791_v24 = vmul.f32 0.5, %v2493_v35  ;;  %v697_v4 = vpop.f32.mrf.mxu2  ;;  %v842_v12 = vpack.c.b16 %v839_v11, %v838_v18 }
 0x13e   :  { %v755_v41 = vpop.f32.mrf.mxu3  ;;  %2494 = vtanh.f32 %v778_v31  ;;  %v707_v57 = vadd.f32 %v697_v4, %v649_v38  ;;  %v606_v42 = vpop.f32.mrf.mxu0 }
 0x13f   :  { %v641_v39 = vpop.f32.mrf.mxu1  ;;  %v798_v30 = vadd.f32 0.5, %v791_v24  ;;  %2032 = vmatmul.msk.bf16.gmra.mxu0 %vm877_vm2, %v842_v12  ;;  %2190 = vmatmul.msk.bf16.vlgmr.msra.gmra.mxu1 %vm877_vm2, %v842_v12  ;;  %v2433_v24 = vld [vmem:[%s3261_s5 + $0x18] sm:$0xff] }
 0x140   :  { %v765_v45 = vadd.f32 %v755_v41, %v707_v57  ;;  %1486 = vmatpush.bf16.msra.mxu3 %v2433_v24  ;;  %v2432_v39 = vld [vmem:[%s3261_s5 + $0x10] sm:$0xff]  ;;  %v2454_v24 = vld [vmem:[%s3261_s5 + $0xc0] sm:$0xff] }
 0x141   :  { %v805_v46 = vpack.c.bf16 %v798_v30, %v798_v30  ;;  %v2431_v30 = vld [vmem:[%s3261_s5 + $0x8] sm:$0xff] }
 0x142   :  { %v772_v40 = vadd.f32 %v2916_v6, %v765_v45 }
 0x143   :  { %v840_v13 = vunpack.c.l.b16 %v805_v46  ;;  %v2437_v46 = vld [vmem:[%s3261_s5 + $0x38] sm:$0xff] }
 0x144   :  { %v2495_v14 = vpop.eup %2494  ;;  %v779_v47 = vmul.f32 0.5, %v772_v40  ;;  %1487 = vmatpush.bf16.msra.mxu3 %v2432_v39  ;;  %1441 = vmatpush.bf16.msra.mxu2 %v2437_v46  ;;  %v2453_v39 = vld [vmem:[%s3261_s5 + $0xb8] sm:$0xff] }
 0x145   :  { %v792_v17 = vmul.f32 0.5, %v2495_v14  ;;  %v1100_v48 = vpack.c.b16 %v840_v13, %v839_v11  ;;  %v699_v49 = vpop.f32.mrf.mxu2  ;;  %v843_v55 = vpack.c.b16 %v840_v13, %v840_v13 }
 0x146   :  { %v757_v32 = vpop.f32.mrf.mxu3  ;;  %2496 = vtanh.f32 %v779_v47  ;;  %v2430_v47 = vld [vmem:[%s3261_s5] sm:$0xff] }
 0x147   :  { %v799_v37 = vadd.f32 0.5, %v792_v17  ;;  %2123 = vmatmul.msk.bf16.gmra.mxu3 %vm877_vm2, %v1100_v48  ;;  %2498 = vtanh.f32 %v495_v63  ;;  %v2436_v48 = vld [vmem:[%s3261_s5 + $0x30] sm:$0xff]  ;;  %v2435_v32 = vld [vmem:[%s3261_s5 + $0x28] sm:$0xff] }
 0x148   :  { %1488 = vmatpush.bf16.msra.mxu3 %v2431_v30  ;;  %1442 = vmatpush.bf16.msra.mxu2 %v2436_v48  ;;  %v2447_v63 = vld [vmem:[%s3261_s5 + $0x88] sm:$0xff] }
 0x149   :  { %v806_v51 = vpack.c.bf16 %v799_v37, %v799_v37  ;;  %v2451_v48 = vld [vmem:[%s3261_s5 + $0xa8] sm:$0xff] }
 0x14b   :  { %v1098_v43 = vunpack.c.l.b16 %v806_v51 }
 0x14c   :  { %v2497_v44 = vpop.eup %2496  ;;  %1489 = vmatpush.bf16.msra.mxu3 %v2430_v47  ;;  %1443 = vmatpush.bf16.msra.mxu2 %v2435_v32 }
 0x14d   :  { %v793_v52 = vmul.f32 0.5, %v2497_v44  ;;  %v1275_v19 = vpack.c.b16 %v1098_v43, %v840_v13  ;;  %v1101_v59 = vpack.c.b16 %v1098_v43, %v1098_v43  ;;  %v2499_v1 = vpop.eup %2498  ;;  %v2444_v43 = vld [vmem:[%s3261_s5 + $0x70] sm:$0xff]  ;;  %v2449_v44 = vld [vmem:[%s3261_s5 + $0x98] sm:$0xff] }
 0x14e   :  { %v509_v2 = vmul.f32 0.5, %v2499_v1  ;;  %v2441_v1 = vld [vmem:[%s3261_s5 + $0x58] sm:$0xff] }
 0x14f   :  { %2033 = vmatmul.msk.bf16.gmra.mxu0 %vm877_vm2, %v843_v55  ;;  %2191 = vmatmul.msk.bf16.gmra.mxu1 %vm877_vm2, %v1275_v19  ;;  %v800_v20 = vadd.f32 0.5, %v793_v52  ;;  %v2443_v52 = vld [vmem:[%s3261_s5 + $0x68] sm:$0xff]  ;;  %v2448_v55 = vld [vmem:[%s3261_s5 + $0x90] sm:$0xff] }
 0x150   :  { %v516_v18 = vadd.f32 0.5, %v509_v2  ;;  %1542 = vmatpush.bf16.msrb.mxu2 %v2444_v43  ;;  %1600 = vmatpush.bf16.msrb.mxu3 %v2449_v44  ;;  %v2450_v43 = vld [vmem:[%s3261_s5 + $0xa0] sm:$0xff] }
 0x151   :  { %v807_v58 = vpack.c.bf16 %v800_v20, %v800_v20 }
 0x152   :  { %v523_v6 = vpack.c.bf16 %v516_v18, %v516_v18 }
 0x153   :  { %v1274_v60 = vunpack.c.l.b16 %v807_v58 }
 0x154   :  { %v1188_v23 = vunpack.c.l.b16 %v523_v6  ;;  %1543 = vmatpush.bf16.msrb.mxu2 %v2443_v52  ;;  %1601 = vmatpush.bf16.msrb.mxu3 %v2448_v55 }
 0x155   :  { %v1276_v22 = vpack.c.b16 %v1274_v60, %v1274_v60  ;;  %v2442_v60 = vld [vmem:[%s3261_s5 + $0x60] sm:$0xff] }
 0x157   :  { %2124 = vmatmul.msk.bf16.gmra.mxu3 %vm877_vm2, %v1101_v59 }
 0x158   :  { %1544 = vmatpush.bf16.msrb.mxu2 %v2442_v60  ;;  %1602 = vmatpush.bf16.msrb.mxu3 %v2447_v63  ;;  %v2461_v63 = vld [vmem:[%s3264_s7 + $0x30] sm:$0xff] }
 0x15c   :  { %1545 = vmatpush.bf16.msrb.mxu2 %v2441_v1  ;;  %v2459_v1 = vld [vmem:[%s3264_s7 + $0x20] sm:$0xff] }
 0x15f   :  { %2156 = vmatmul.msk.bf16.vlgmr.msra.gmra.mxu0 %vm877_vm2, %v2982_v56  ;;  %2192 = vmatmul.msk.bf16.gmra.mxu1 %vm877_vm2, %v1276_v22  ;;  %v1190_v56 = vpack.c.b16 %v1188_v23, %v1188_v23  ;;  %v2468_v22 = vld [vmem:[%s3260_s4] ss:$0 sm:$0xff] }
 0x165   :  { %v981_v0 = vpop.f32.mrf.mxu1 }
 0x16d   :  { %v983_v50 = vpop.f32.mrf.mxu1 }
 0x16f   :  { %2157 = vmatmul.msk.bf16.gmra.mxu0 %vm877_vm2, %v1189_v36 }
 0x173   :  { %v1066_v3 = vpop.f32.mrf.mxu2 }
 0x175   :  { %v986_v21 = vpop.f32.mrf.mxu1 }
 0x17b   :  { %v1068_v28 = vpop.f32.mrf.mxu2 }
 0x17d   :  { %v988_v53 = vpop.f32.mrf.mxu1 }
 0x17f   :  { %2158 = vmatmul.msk.bf16.gmra.mxu0 %vm877_vm2, %v1190_v56 }
 0x183   :  { %v1071_v54 = vpop.f32.mrf.mxu2 }
 0x185   :  { %v991_v5 = vpop.f32.mrf.mxu1 }
 0x18b   :  { %v1073_v7 = vpop.f32.mrf.mxu2 }
 0x18d   :  { %v993_v8 = vpop.f32.mrf.mxu1 }
 0x193   :  { %v1076_v15 = vpop.f32.mrf.mxu2 }
 0x19b   :  { %v1078_v16 = vpop.f32.mrf.mxu2 }
 0x1ac   :  { %v900_v10 = vpop.f32.mrf.mxu0 }
 0x1ad   :  { %v982_v36 = vadd.f32 %v981_v0, %v900_v10 }
 0x1af   :  { %v1080_v9 = vadd.f32 %v1066_v3, %v982_v36 }
 0x1b4   :  { %v902_v25 = vpop.f32.mrf.mxu0 }
 0x1b5   :  { %v984_v27 = vadd.f32 %v983_v50, %v902_v25  ;;  %v2446_v50 = vld [vmem:[%s3261_s5 + $0x80] sm:$0xff] }
 0x1b6   :  { %1603 = vmatpush.bf16.msrb.mxu3 %v2446_v50  ;;  %v2458_v50 = vld [vmem:[%s3264_s7 + $0x18] sm:$0xff] }
 0x1b7   :  { %v1081_v33 = vadd.f32 %v1068_v28, %v984_v27  ;;  %v2440_v28 = vld [vmem:[%s3261_s5 + $0x50] sm:$0xff] }
 0x1b8   :  { %1546 = vmatpush.bf16.msrb.mxu2 %v2440_v28  ;;  %v2455_v28 = vld [vmem:[%s3264_s7] sm:$0xff] }
 0x1ba   :  { %v1156_v34 = vpop.f32.mrf.mxu3 }
 0x1bb   :  { %v1170_v20 = vadd.f32 %v1156_v34, %v1080_v9 }
 0x1bc   :  { %v905_v11 = vpop.f32.mrf.mxu0  ;;  %v1328_v35 = vpop.f32.mrf.mxu1 }
 0x1bd   :  { %v987_v31 = vadd.f32 %v986_v21, %v905_v11 }
 0x1bf   :  { %v3117_v38 = vadd.f32 %v1071_v54, %v987_v31 }
 0x1c2   :  { %v1158_v4 = vpop.f32.mrf.mxu3 }
 0x1c3   :  { %v1171_v3 = vadd.f32 %v1158_v4, %v1081_v33 }
 0x1c4   :  { %v907_v41 = vpop.f32.mrf.mxu0  ;;  %v1330_v12 = vpop.f32.mrf.mxu1 }
 0x1c5   :  { %v989_v57 = vadd.f32 %v988_v53, %v907_v41  ;;  %v2445_v53 = vld [vmem:[%s3261_s5 + $0x78] sm:$0xff] }
 0x1c6   :  { %1604 = vmatpush.bf16.msrb.mxu3 %v2445_v53 }
 0x1c7   :  { %v3125_v42 = vadd.f32 %v1073_v7, %v989_v57 }
 0x1ca   :  { %v1161_v45 = vpop.f32.mrf.mxu3 }
 0x1cb   :  { %v1172_v8 = vadd.f32 %v1161_v45, %v3117_v38 }
 0x1cc   :  { %v910_v40 = vpop.f32.mrf.mxu0  ;;  %v1333_v13 = vpop.f32.mrf.mxu1 }
 0x1cd   :  { %v992_v14 = vadd.f32 %v991_v5, %v910_v40  ;;  %v2452_v40 = vld [vmem:[%s3261_s5 + $0xb0] sm:$0xff] }
 0x1cf   :  { %v3136_v17 = vadd.f32 %v1076_v15, %v992_v14 }
 0x1d2   :  { %v1163_v49 = vpop.f32.mrf.mxu3 }
 0x1d3   :  { %v1173_v27 = vadd.f32 %v1163_v49, %v3125_v42 }
 0x1d4   :  { %v912_v37 = vpop.f32.mrf.mxu0  ;;  %v1335_v51 = vpop.f32.mrf.mxu1 }
 0x1da   :  { %v1166_v19 = vpop.f32.mrf.mxu3 }
 0x1dc   :  { %v1242_v58 = vpop.f32.mrf.mxu0  ;;  %v1338_v59 = vpop.f32.mrf.mxu1 }
 0x1dd   :  { %v1256_v62 = vadd.f32 %v1242_v58, %v1170_v20 }
 0x1df   :  { %v1342_v0 = vadd.f32 %v1328_v35, %v1256_v62 }
 0x1e1   :  { %v1351_v2 = vadd.f32 %v2468_v22, %v1342_v0  ;;  %v2460_v0 = vld [vmem:[%s3264_s7 + $0x28] sm:$0xff] }
 0x1e2   :  { %v1168_v18 = vpop.f32.mrf.mxu3 }
 0x1e3   :  { %v1356_v6 = vmul.f32 0.5, %v1351_v2 }
 0x1e4   :  { %v1244_v21 = vpop.f32.mrf.mxu0  ;;  %v1340_v23 = vpop.f32.mrf.mxu1 }
 0x1e5   :  { %2500 = vtanh.f32 %v1356_v6  ;;  %v1257_v56 = vadd.f32 %v1244_v21, %v1171_v3  ;;  %v2457_v6 = vld [vmem:[%s3264_s7 + $0x10] sm:$0xff]  ;;  %v2456_v23 = vld [vmem:[%s3264_s7 + $0x8] sm:$0xff] }
 0x1e7   :  { %v1343_v54 = vadd.f32 %v1330_v12, %v1257_v56  ;;  %v1174_v12 = vadd.f32 %v1166_v19, %v3136_v17 }
 0x1e9   :  { %v1352_v5 = vadd.f32 %v2468_v22, %v1343_v54  ;;  %v1779_v54 = vld [vmem:[%s3265_s9 + $0x28] sm:$0x3] }
 0x1eb   :  { %v2501_v7 = vpop.eup %2500  ;;  %v1357_v15 = vmul.f32 0.5, %v1352_v5  ;;  %v1805_v5 = vunpack.c.l.b16 %v1779_v54 }
 0x1ec   :  { %v1366_v16 = vmul.f32 0.5, %v2501_v7  ;;  %v1247_v61 = vpop.f32.mrf.mxu0 }
 0x1ed   :  { %2502 = vtanh.f32 %v1357_v15  ;;  %v1258_v10 = vadd.f32 %v1247_v61, %v1172_v8  ;;  %v1811_v7 = vpack.c.b16 %v1805_v5, %v1805_v5 }
 0x1ee   :  { %v1371_v36 = vadd.f32 0.5, %v1366_v16 }
 0x1ef   :  { %v1344_v9 = vadd.f32 %v1333_v13, %v1258_v10  ;;  %v1821_v61 = vsel %vm887_vm1, %v1811_v7, 0  ;;  %v2466_v10 = vld [vmem:[%s3265_s9 + $0x20] sm:$0xff] }
 0x1f0   :  { %v1376_v25 = vpack.c.bf16 %v1371_v36, %v1371_v36 }
 0x1f1   :  { %v1353_v29 = vadd.f32 %v2468_v22, %v1344_v9 }
 0x1f2   :  { %2244 = vmatmul.msk.bf16.vlgmr.msra.gmra.mxu3 %vm1432_vm3, %v1376_v25  ;;  %v2469_v25 = vld [vmem:[%s3262_s6] ss:$0 sm:$0xff] }
 0x1f3   :  { %v2503_v26 = vpop.eup %2502  ;;  %v1358_v33 = vmul.f32 0.5, %v1353_v29  ;;  %1825 = vmatpush.bf16.msra.mxu3 %v1821_v61 }
 0x1f4   :  { %v1367_v34 = vmul.f32 0.5, %v2503_v26  ;;  %v1249_v11 = vpop.f32.mrf.mxu0 }
 0x1f5   :  { %v1259_v35 = vadd.f32 %v1249_v11, %v1173_v27  ;;  %2504 = vtanh.f32 %v1358_v33 }
 0x1f6   :  { %v1372_v31 = vadd.f32 0.5, %v1367_v34 }
 0x1f7   :  { %v1345_v38 = vadd.f32 %v1335_v51, %v1259_v35  ;;  %1826 = vmatpush.bf16.msra.mxu3 %v2466_v10 }
 0x1f8   :  { %v1377_v4 = vpack.c.bf16 %v1372_v31, %v1372_v31 }
 0x1f9   :  { %v1354_v41 = vadd.f32 %v2468_v22, %v1345_v38 }
 0x1fa   :  { %2223 = vmatmul.msk.bf16.vlgmr.msra.gmra.mxu2 %vm1432_vm3, %v1377_v4  ;;  %v2464_v4 = vld [vmem:[%s3265_s9 + $0x10] sm:$0xff] }
 0x1fb   :  { %v1359_v57 = vmul.f32 0.5, %v1354_v41  ;;  %1658 = vmatpush.bf16.msra.mxu2 %v2454_v24  ;;  %v2505_v30 = vpop.eup %2504  ;;  %v2465_v24 = vld [vmem:[%s3265_s9 + $0x18] sm:$0xff]  ;;  %v2463_v41 = vld [vmem:[%s3265_s9 + $0x8] sm:$0xff] }
 0x1fc   :  { %v1252_v42 = vpop.f32.mrf.mxu0  ;;  %v1368_v13 = vmul.f32 0.5, %v2505_v30  ;;  %1827 = vmatpush.bf16.msra.mxu3 %v2465_v24 }
 0x1fd   :  { %2506 = vtanh.f32 %v1359_v57  ;;  %v1260_v45 = vadd.f32 %v1252_v42, %v1174_v12  ;;  %v2462_v12 = vld [vmem:[%s3265_s9] sm:$0xff] }
 0x1fe   :  { %v1373_v49 = vadd.f32 0.5, %v1368_v13  ;;  %v2470_v57 = vld [vmem:[%s3263_s8] ss:$0 sm:$0xff] }
 0x1ff   :  { %v1346_v46 = vadd.f32 %v1338_v59, %v1260_v45  ;;  %1659 = vmatpush.bf16.msra.mxu2 %v2453_v39  ;;  %v1693_v59 = vld [vmem:[%s3264_s7 + $0x38] sm:$0xf] }
 0x200   :  { %v1378_v44 = vpack.c.bf16 %v1373_v49, %v1373_v49  ;;  %v1727_v60 = vunpack.c.l.b16 %v1693_v59  ;;  %1828 = vmatpush.bf16.msra.mxu3 %v2464_v4 }
 0x201   :  { %v1355_v14 = vadd.f32 %v2468_v22, %v1346_v46 }
 0x202   :  { %v1735_v62 = vpack.c.b16 %v1727_v60, %v1727_v60 }
 0x203   :  { %v2507_v47 = vpop.eup %2506  ;;  %v1360_v17 = vmul.f32 0.5, %v1355_v14  ;;  %1660 = vmatpush.bf16.msra.mxu2 %v2452_v40 }
 0x204   :  { %v1369_v32 = vmul.f32 0.5, %v2507_v47  ;;  %v1254_v37 = vpop.f32.mrf.mxu0  ;;  %v1749_v22 = vsel %vm1747_vm4, %v1735_v62, 0  ;;  %1829 = vmatpush.bf16.msra.mxu3 %v2463_v41  ;;  %v2471_v47 = vld [vmem:[%s3266_s10] ss:$0 sm:$0xff] }
 0x205   :  { %2508 = vtanh.f32 %v1360_v17  ;;  %1751 = vmatpush.bf16.msrb.mxu0 %v1749_v22 }
 0x206   :  { %v1374_v51 = vadd.f32 0.5, %v1369_v32 }
 0x207   :  { %1661 = vmatpush.bf16.msra.mxu2 %v2451_v48 }
 0x208   :  { %v1379_v52 = vpack.c.bf16 %v1374_v51, %v1374_v51  ;;  %1830 = vmatpush.bf16.msra.mxu3 %v2462_v12 }
 0x209   :  { %1752 = vmatpush.bf16.msrb.mxu0 %v2461_v63 }
 0x20a   :  { %2275 = vmatmul.msk.bf16.vlgmr.msrb.gmra.mxu2 %vm1432_vm3, %v1378_v44  ;;  %2306 = vmatmul.msk.bf16.vlgmr.msrb.gmra.mxu3 %vm1432_vm3, %v1379_v52 }
 0x20b   :  { %1662 = vmatpush.bf16.msra.mxu2 %v2450_v43  ;;  %v2509_v55 = vpop.eup %2508 }
 0x20c   :  { %v1370_v19 = vmul.f32 0.5, %v2509_v55 }
 0x20d   :  { %1753 = vmatpush.bf16.msrb.mxu0 %v2460_v0 }
 0x20e   :  { %v1375_v20 = vadd.f32 0.5, %v1370_v19 }
 0x210   :  { %v1380_v58 = vpack.c.bf16 %v1375_v20, %v1375_v20 }
 0x211   :  { %1754 = vmatpush.bf16.msrb.mxu0 %v2459_v1 }
 0x215   :  { %1755 = vmatpush.bf16.msrb.mxu0 %v2458_v50 }
 0x219   :  { %1756 = vmatpush.bf16.msrb.mxu0 %v2457_v6 }
 0x21a   :  { %2337 = vmatmul.msk.bf16.vlgmr.msra.gmra.mxu2 %vm1432_vm3, %v1380_v58 }
 0x21d   :  { %1757 = vmatpush.bf16.msrb.mxu0 %v2456_v23 }
 0x221   :  { %1758 = vmatpush.bf16.msrb.mxu0 %v2455_v28 }
 0x275   :  { %v1491_v2 = vpop.f32.mrf.mxu3 }
 0x27d   :  { %v1445_v18 = vpop.f32.mrf.mxu2  ;;  %v1493_v3 = vpop.f32.mrf.mxu3 }
 0x27e   :  { %v1492_v16 = vadd.f32 %v1491_v2, %v1445_v18 }
 0x285   :  { %v1447_v21 = vpop.f32.mrf.mxu2 }
 0x28d   :  { %v1548_v56 = vpop.f32.mrf.mxu2  ;;  %v1606_v53 = vpop.f32.mrf.mxu3 }
 0x28e   :  { %v1552_v36 = vadd.f32 %v1548_v56, %v1492_v16 }
 0x290   :  { %v1610_v9 = vadd.f32 %v1606_v53, %v1552_v36 }
 0x295   :  { %v1550_v8 = vpop.f32.mrf.mxu2  ;;  %v1608_v15 = vpop.f32.mrf.mxu3 }
 0x29d   :  { %v1664_v29 = vpop.f32.mrf.mxu2 }
 0x29e   :  { %v1668_v26 = vadd.f32 %v1664_v29, %v1610_v9 }
 0x2a0   :  { %v1673_v27 = vadd.f32 %v2469_v25, %v1668_v26 }
 0x2a2   :  { %v1674_v33 = vmul.f32 0.5, %v1673_v27 }
 0x2a4   :  { %2510 = vtanh.f32 %v1674_v33 }
 0x2a5   :  { %v1666_v34 = vpop.f32.mrf.mxu2 }
 0x2aa   :  { %v2511_v11 = vpop.eup %2510 }
 0x2ab   :  { %v1676_v35 = vmul.f32 0.5, %v2511_v11 }
 0x2ad   :  { %v1677_v31 = vadd.f32 0.5, %v1676_v35 }
 0x2af   :  { %v1678_v38 = vpack.c.bf16 %v1677_v31, %v1677_v31 }
 0x2b1   :  { %2366 = vmatmul.msk.bf16.vlgmr.msrb.gmra.mxu0 %vm1743_vm5, %v1678_v38 }
 0x32e   :  { %v1760_v39 = vpop.f32.mrf.mxu0 }
 0x32f   :  { %v1761_v42 = vadd.f32 %v2470_v57, %v1760_v39 }
 0x331   :  { %v1764_v30 = vmul.f32 0.5, %v1761_v42 }
 0x333   :  { %2512 = vtanh.f32 %v1764_v30 }
 0x336   :  { %v1762_v45 = vpop.f32.mrf.mxu0 }
 0x339   :  { %v2513_v46 = vpop.eup %2512 }
 0x33a   :  { %v1766_v40 = vmul.f32 0.5, %v2513_v46 }
 0x33c   :  { %v1767_v13 = vadd.f32 0.5, %v1766_v40 }
 0x33e   :  { %v1768_v14 = vpack.c.bf16 %v1767_v13, %v1767_v13 }
 0x340   :  { %2387 = vmatmul.msk.bf16.vlgmr.msra.gmra.mxu3 %vm877_vm2, %v1768_v14 }
 0x3c3   :  { %v1832_v17 = vpop.f32.mrf.mxu3 }
 0x3c4   :  { %v1833_v48 = vadd.f32 %v2471_v47, %v1832_v17 }
 0x3c6   :  { %1837 = vst.msk [vmem:[%s3267_s11] sm:$0xff] %vm1836_vm6, %v1833_v48 }
 0x3cb   :  { %v1834_v49 = vpop.f32.mrf.mxu3 }

</bundles_post_ra>
